<compile_context>
chip_gen: v7x
topology: tpu7x:2x2x1
jax: 0.10.0
libtpu: 0.0.40
codegen_flags: <defaults>
</compile_context>

<pallas_src>
import jax
import jax.numpy as jnp
from jax.experimental import pallas as pl
from jax.experimental.pallas import tpu as pltpu

# ----------------------------- configuration (small, synthetic) -----------------------
BATCH = 2
SEQ = 128
HIDDEN = 32
VOCAB = 64
NUM_POS = 8
NUM_TAG = 16
C_TOTAL = NUM_TAG + NUM_POS        # 24 logit columns actually used
NLL_COL = C_TOTAL                  # spare lane carrying the per-row masked NLL
C_PAD = 128                        # lane-dense output slab (unmasked vst)
LN_EPS = 1e-5
NEG = -1e30                        # bias of pad columns -> exp underflows to exactly 0
IGNORE_INDEX = -100                # nn.CrossEntropyLoss default; see note in wrapper

# Row tile.  Production guidance: multiples of 256 (v6e/v7x MXU) or 128 (v5e), sized
# so 2x(bf16 x-in) + 2x(f32 out) + resident weights stay well under v7x's 64 MiB VMEM
# (e.g. TILE_N = 512 at H = 768 is ~3 MiB).  128 keeps the toy demo on a 2-step grid.
TILE_N = 128


# ------------------------------- fused Pallas kernel ----------------------------------
def _fused_kernel(x_ref, w_ref, b_ref, meta_ref, out_ref):
    """One row tile: shared LN-core, folded-head matmul, dual masked CE.

    x_ref    [TILE_N, H]   bf16  backbone activations
    w_ref    [H, 128]      bf16  folded weights (cols: [tag | pos | zero pad])
    b_ref    [1, 128]      f32   folded bias    (pad cols = NEG)
    meta_ref [TILE_N, 1]   int32 packed: tag_label | pos_label << 8 | mask << 16
    out_ref  [TILE_N, 128] f32   cols [0,16)=tag logits, [16,24)=pos logits,
                                 col 24 = per-row masked (nll_tag + nll_pos)
    """
    xf = x_ref[...].astype(jnp.float32)                     # f32 LN math (v5e-safe)
    inv_h = 1.0 / xf.shape[-1]

    # One-pass LayerNorm statistics: var = E[x^2] - mu^2.
    mu = jnp.sum(xf, axis=-1, keepdims=True) * inv_h
    var = jnp.sum(xf * xf, axis=-1, keepdims=True) * inv_h - mu * mu
    norm = ((xf - mu) * jax.lax.rsqrt(var + LN_EPS)).astype(jnp.bfloat16)

    # Single MXU matmul into the lane-dense 128-column slab.
    logits = (jnp.dot(norm, w_ref[...], preferred_element_type=jnp.float32)
              + b_ref[...])                                 # [TILE_N, 128]

    # Unpack per-row metadata (one int32 per row).
    meta = meta_ref[...]                                    # [TILE_N, 1]
    tag_col = meta & 0xFF                                   # target lane in [0, 16)
    pos_col = ((meta >> 8) & 0xFF) + NUM_TAG                # target lane in [16, 24)
    active = ((meta >> 16) & 1).astype(jnp.float32)         # attention_mask == 1

    n, c = logits.shape
    col = jax.lax.broadcasted_iota(jnp.int32, (n, c), 1)
    is_tag = col < NUM_TAG

    # Two group LSEs from ONE exp pass over the whole slab (pad lanes underflow to 0
    # because their folded bias is NEG).
    m_tag = jnp.max(jnp.where(is_tag, logits, NEG), axis=-1, keepdims=True)
    m_pos = jnp.max(jnp.where(is_tag, NEG, logits), axis=-1, keepdims=True)
    e = jnp.exp(logits - jnp.where(is_tag, m_tag, m_pos))
    s_tag = jnp.sum(jnp.where(is_tag, e, 0.0), axis=-1, keepdims=True)
    s_pos = jnp.sum(jnp.where(is_tag, 0.0, e), axis=-1, keepdims=True)
    lse_sum = m_tag + jnp.log(s_tag) + m_pos + jnp.log(s_pos)

    # Both target logits picked with a single select/reduce (targets never hit pads).
    picked = jnp.sum(
        jnp.where((col == tag_col) | (col == pos_col), logits, 0.0),
        axis=-1, keepdims=True)

    nll = active * (lse_sum - picked)                       # [TILE_N, 1]

    # Lane-dense unmasked store: logits slab with the masked NLL folded into lane 24.
    out_ref[...] = jnp.where(col == NLL_COL, nll, logits)


# ------------------------------- whole-forward wrapper ---------------------------------
@jax.jit
def model_forward(params, input_ids, attention_mask, target_pos, target_tag):
    """Mirrors Model.forward: returns (pos, tag, loss)."""
    # Backbone stub (plain JAX glue): deterministic embedding lookup -> [B, S, H].
    last_hidden_state = params["emb"][input_ids]
    b, s, h = last_hidden_state.shape
    n = b * s
    x = last_hidden_state.reshape(n, h).astype(jnp.bfloat16)   # bf16 activation stream

    # Fold LayerNorm gamma/beta into head weights/biases (exact algebra):
    #   (LNcore(x)*g + be) @ W + bias == LNcore(x) @ (g[:,None]*W) + (be @ W + bias)
    w_tag = params["ln1_g"].reshape(h, 1) * params["wt"]        # [H, NUM_TAG]
    b_tag = params["ln1_b"] @ params["wt"] + params["bt"]       # [1, NUM_TAG]
    w_pos = params["ln2_g"].reshape(h, 1) * params["wp"]        # [H, NUM_POS]
    b_pos = params["ln2_b"] @ params["wp"] + params["bp"]       # [1, NUM_POS]

    w_all = jnp.zeros((h, C_PAD), jnp.float32)
    w_all = w_all.at[:, :NUM_TAG].set(w_tag).at[:, NUM_TAG:C_TOTAL].set(w_pos)
    w_all = w_all.astype(jnp.bfloat16)
    b_all = jnp.full((1, C_PAD), NEG, jnp.float32)              # pad columns -> -1e30
    b_all = b_all.at[:, :NUM_TAG].set(b_tag).at[:, NUM_TAG:C_TOTAL].set(b_pos)

    # Pack labels + mask into one int32 per row (one DMA stream instead of three).
    # NOTE: like nn.CrossEntropyLoss(ignore_index=-100) in the reference module, rows
    # with attention_mask == 0 are dropped; labels at active positions are assumed to
    # be valid class indices (same assumption the original data pipeline guarantees).
    meta = (target_tag.reshape(n).astype(jnp.int32)
            | (target_pos.reshape(n).astype(jnp.int32) << 8)
            | (attention_mask.reshape(n).astype(jnp.int32) << 16)).reshape(n, 1)

    # Pad the row dimension up to the tile size (padded rows carry mask bit 0).
    n_pad = pl.cdiv(n, TILE_N) * TILE_N
    if n_pad != n:
        x = jnp.pad(x, ((0, n_pad - n), (0, 0)))
        meta = jnp.pad(meta, ((0, n_pad - n), (0, 0)))

    out = pl.pallas_call(
        _fused_kernel,
        out_shape=jax.ShapeDtypeStruct((n_pad, C_PAD), jnp.float32),
        grid=(n_pad // TILE_N,),
        in_specs=[
            pl.BlockSpec((TILE_N, h), lambda i: (i, 0)),        # activations (streamed)
            pl.BlockSpec((h, C_PAD), lambda i: (0, 0)),         # folded weights (resident)
            pl.BlockSpec((1, C_PAD), lambda i: (0, 0)),         # folded bias    (resident)
            pl.BlockSpec((TILE_N, 1), lambda i: (i, 0)),        # packed metadata
        ],
        out_specs=pl.BlockSpec((TILE_N, C_PAD), lambda i: (i, 0)),
        compiler_params=pltpu.CompilerParams(
            dimension_semantics=("parallel",),                  # v7x: shard rows on 2 TCs
            vmem_limit_bytes=32 * 1024 * 1024,
        ),
    )(x, w_all, b_all, meta)

    slab = out[:n]
    tag = slab[:, :NUM_TAG].reshape(b, s, NUM_TAG)
    pos = slab[:, NUM_TAG:C_TOTAL].reshape(b, s, NUM_POS)

    # Tiny final reduction kept outside the kernel (no cross-tile accumulator).
    denom = jnp.sum((attention_mask == 1).astype(jnp.float32))
    loss = 0.5 * jnp.sum(slab[:, NLL_COL]) / denom              # NaN if mask all-zero,
    return pos, tag, loss                                       # same as the reference.


# ------------------------------- pure-JAX reference ------------------------------------
def _ref_forward(params, input_ids, attention_mask, target_pos, target_tag):
    # Reference of the module's math (unfolded LN, f32 weights, two-pass variance),
    # fed the same bf16-rounded activation stream the kernel consumes.
    x = params["emb"][input_ids].astype(jnp.bfloat16).astype(jnp.float32)
    b, s, h = x.shape
    xf = x.reshape(b * s, h)

    def ln(v, g, be):
        mu = jnp.mean(v, axis=-1, keepdims=True)
        var = jnp.mean((v - mu) ** 2, axis=-1, keepdims=True)
        return (v - mu) / jnp.sqrt(var + LN_EPS) * g + be

    tag = ln(xf, params["ln1_g"], params["ln1_b"]) @ params["wt"] + params["bt"]
    pos = ln(xf, params["ln2_g"], params["ln2_b"]) @ params["wp"] + params["bp"]

    def ce(logits, labels, mask):
        lse = jax.scipy.special.logsumexp(logits, axis=-1)
        picked = jnp.take_along_axis(logits, labels[:, None], axis=-1)[:, 0]
        act = (mask == 1).astype(jnp.float32)
        return jnp.sum((lse - picked) * act) / jnp.sum(act)

    mask = attention_mask.reshape(-1)
    lt = ce(tag, target_tag.reshape(-1), mask)
    lp = ce(pos, target_pos.reshape(-1), mask)
    return pos.reshape(b, s, NUM_POS), tag.reshape(b, s, NUM_TAG), (lp + lt) / 2.0


# ------------------------------- main --------------------------------------------------
def _init_params(key):
    ks = jax.random.split(key, 8)
    return {
        # backbone stand-in
        "emb": jax.random.normal(ks[0], (VOCAB, HIDDEN), jnp.float32) * 0.5,
        # LayerNorm params (randomized away from the ones/zeros default so the
        # gamma/beta -> weight folding is actually exercised), stored as [1, H].
        "ln1_g": 1.0 + 0.1 * jax.random.normal(ks[1], (1, HIDDEN), jnp.float32),
        "ln1_b": 0.1 * jax.random.normal(ks[2], (1, HIDDEN), jnp.float32),
        "ln2_g": 1.0 + 0.1 * jax.random.normal(ks[3], (1, HIDDEN), jnp.float32),
        "ln2_b": 0.1 * jax.random.normal(ks[4], (1, HIDDEN), jnp.float32),
        # Linear heads: PyTorch stores W as [out, in]; kernel uses [in, out].
        "wt": (jax.random.uniform(ks[5], (NUM_TAG, HIDDEN), jnp.float32,
                                  -1.0, 1.0) / jnp.sqrt(HIDDEN)).T,
        "bt": jnp.zeros((1, NUM_TAG), jnp.float32),
        "wp": (jax.random.uniform(ks[6], (NUM_POS, HIDDEN), jnp.float32,
                                  -1.0, 1.0) / jnp.sqrt(HIDDEN)).T,
        "bp": jnp.zeros((1, NUM_POS), jnp.float32),
    }


if __name__ == "__main__":
    key = jax.random.PRNGKey(0)
    pkey, k_ids, k_mask, k_tpos, k_ttag = jax.random.split(key, 5)

    params = _init_params(pkey)

    input_ids = jax.random.randint(k_ids, (BATCH, SEQ), 0, VOCAB, jnp.int32)
    attention_mask = jax.random.randint(k_mask, (BATCH, SEQ), 0, 2, jnp.int32)
    attention_mask = attention_mask.at[:, 0].set(1)   # guarantee >=1 active token
    target_pos = jax.random.randint(k_tpos, (BATCH, SEQ), 0, NUM_POS, jnp.int32)
    target_tag = jax.random.randint(k_ttag, (BATCH, SEQ), 0, NUM_TAG, jnp.int32)

    pos, tag, loss = model_forward(params, input_ids, attention_mask,
                                   target_pos, target_tag)
    jax.block_until_ready((pos, tag, loss))

    pos_ref, tag_ref, loss_ref = _ref_forward(params, input_ids, attention_mask,
                                              target_pos, target_tag)
    # Tolerance covers the bf16 rounding of the kernel's MXU operands (activations
    # and folded head weights); everything else is f32-exact math.
    assert jnp.allclose(pos, pos_ref, rtol=2e-2, atol=2e-2)
    assert jnp.allclose(tag, tag_ref, rtol=2e-2, atol=2e-2)
    assert jnp.allclose(loss, loss_ref, rtol=2e-2, atol=2e-2)

    print("KERNEL_OK")
</pallas_src>

<mosaic_0001>
module attributes {stable_mosaic.version = 11 : i64} {
  func.func @_fused_kernel(%arg0: i32, %arg1: memref<128x32xbf16, #tpu.memory_space<vmem>>, %arg2: memref<32x128xbf16, #tpu.memory_space<vmem>>, %arg3: memref<1x128xf32, #tpu.memory_space<vmem>>, %arg4: memref<128x1xi32, #tpu.memory_space<vmem>>, %arg5: memref<128x128xf32, #tpu.memory_space<vmem>>) attributes {dimension_semantics = [#tpu.dimension_semantics<parallel>], iteration_bounds = array<i64: 2>, scalar_prefetch = 0 : i64, scratch_operands = 0 : i64, tpu.core_type = #tpu.core_type<tc>, window_params = [{transform_indices = @transform_0, window_bounds = array<i64: 128, 32>}, {pipeline_mode = #tpu.pipeline_mode<synchronous>, transform_indices = @transform_1, window_bounds = array<i64: 32, 128>}, {pipeline_mode = #tpu.pipeline_mode<synchronous>, transform_indices = @transform_2, window_bounds = array<i64: 1, 128>}, {transform_indices = @transform_3, window_bounds = array<i64: 128, 1>}, {transform_indices = @transform_4, window_bounds = array<i64: 128, 128>}]} {
    %c0 = arith.constant 0 : index
    %c0_0 = arith.constant 0 : index
    %0 = vector.load %arg1[%c0, %c0_0] : memref<128x32xbf16, #tpu.memory_space<vmem>>, vector<128x32xbf16>
    %1 = arith.extf %0 : vector<128x32xbf16> to vector<128x32xf32>
    %cst = arith.constant dense<0.000000e+00> : vector<128xf32>
    %2 = vector.multi_reduction <add>, %1, %cst [1] : vector<128x32xf32> to vector<128xf32>
    %3 = vector.shape_cast %2 : vector<128xf32> to vector<128x1xf32>
    %cst_1 = arith.constant 3.125000e-02 : f32
    %4 = vector.broadcast %cst_1 : f32 to vector<128x1xf32>
    %5 = arith.mulf %3, %4 : vector<128x1xf32>
    %6 = arith.mulf %1, %1 : vector<128x32xf32>
    %cst_2 = arith.constant dense<0.000000e+00> : vector<128xf32>
    %7 = vector.multi_reduction <add>, %6, %cst_2 [1] : vector<128x32xf32> to vector<128xf32>
    %8 = vector.shape_cast %7 : vector<128xf32> to vector<128x1xf32>
    %cst_3 = arith.constant 3.125000e-02 : f32
    %9 = vector.broadcast %cst_3 : f32 to vector<128x1xf32>
    %10 = arith.mulf %8, %9 : vector<128x1xf32>
    %11 = arith.mulf %5, %5 : vector<128x1xf32>
    %12 = arith.subf %10, %11 : vector<128x1xf32>
    %13 = vector.broadcast %5 : vector<128x1xf32> to vector<128x32xf32>
    %14 = arith.subf %1, %13 : vector<128x32xf32>
    %cst_4 = arith.constant 9.99999974E-6 : f32
    %15 = vector.broadcast %cst_4 : f32 to vector<128x1xf32>
    %16 = arith.addf %12, %15 : vector<128x1xf32>
    %17 = math.rsqrt %16 : vector<128x1xf32>
    %18 = vector.broadcast %17 : vector<128x1xf32> to vector<128x32xf32>
    %19 = arith.mulf %14, %18 : vector<128x32xf32>
    %20 = arith.truncf %19 : vector<128x32xf32> to vector<128x32xbf16>
    %c0_5 = arith.constant 0 : index
    %c0_6 = arith.constant 0 : index
    %21 = vector.load %arg2[%c0_5, %c0_6] : memref<32x128xbf16, #tpu.memory_space<vmem>>, vector<32x128xbf16>
    %cst_7 = arith.constant dense<0.000000e+00> : vector<128x128xf32>
    %22 = tpu.matmul %20, %21, %cst_7 {dimension_numbers = #tpu.dot_dimension_numbers<[1], [0], [0], [1], [0, 0, 1, 1], [], []>} : vector<128x32xbf16>, vector<32x128xbf16>, vector<128x128xf32> -> vector<128x128xf32>
    %c0_8 = arith.constant 0 : index
    %c0_9 = arith.constant 0 : index
    %23 = vector.load %arg3[%c0_8, %c0_9] : memref<1x128xf32, #tpu.memory_space<vmem>>, vector<1x128xf32>
    %24 = vector.broadcast %23 : vector<1x128xf32> to vector<128x128xf32>
    %25 = arith.addf %22, %24 : vector<128x128xf32>
    %c0_10 = arith.constant 0 : index
    %c0_11 = arith.constant 0 : index
    %26 = vector.load %arg4[%c0_10, %c0_11] : memref<128x1xi32, #tpu.memory_space<vmem>>, vector<128x1xi32>
    %c255_i32 = arith.constant 255 : i32
    %27 = vector.broadcast %c255_i32 : i32 to vector<128x1xi32>
    %28 = arith.andi %26, %27 : vector<128x1xi32>
    %c8_i32 = arith.constant 8 : i32
    %29 = vector.broadcast %c8_i32 : i32 to vector<128x1xi32>
    %30 = arith.shrsi %26, %29 : vector<128x1xi32>
    %c255_i32_12 = arith.constant 255 : i32
    %31 = vector.broadcast %c255_i32_12 : i32 to vector<128x1xi32>
    %32 = arith.andi %30, %31 : vector<128x1xi32>
    %c16_i32 = arith.constant 16 : i32
    %33 = vector.broadcast %c16_i32 : i32 to vector<128x1xi32>
    %34 = arith.addi %32, %33 : vector<128x1xi32>
    %c16_i32_13 = arith.constant 16 : i32
    %35 = vector.broadcast %c16_i32_13 : i32 to vector<128x1xi32>
    %36 = arith.shrsi %26, %35 : vector<128x1xi32>
    %c1_i32 = arith.constant 1 : i32
    %37 = vector.broadcast %c1_i32 : i32 to vector<128x1xi32>
    %38 = arith.andi %36, %37 : vector<128x1xi32>
    %39 = arith.sitofp %38 : vector<128x1xi32> to vector<128x1xf32>
    %40 = tpu.iota {dimensions = array<i32: 1>} : vector<128x128xi32>
    %c16_i32_14 = arith.constant 16 : i32
    %41 = vector.broadcast %c16_i32_14 : i32 to vector<128x128xi32>
    %42 = arith.cmpi slt, %40, %41 : vector<128x128xi32>
    %cst_15 = arith.constant -1.000000e+30 : f32
    %43 = vector.broadcast %cst_15 : f32 to vector<128x128xf32>
    %44 = arith.select %42, %25, %43 : vector<128x128xi1>, vector<128x128xf32>
    %cst_16 = arith.constant dense<0xFF800000> : vector<128xf32>
    %45 = vector.multi_reduction <maximumf>, %44, %cst_16 [1] : vector<128x128xf32> to vector<128xf32>
    %46 = vector.shape_cast %45 : vector<128xf32> to vector<128x1xf32>
    %cst_17 = arith.constant -1.000000e+30 : f32
    %47 = vector.broadcast %cst_17 : f32 to vector<128x128xf32>
    %48 = arith.select %42, %47, %25 : vector<128x128xi1>, vector<128x128xf32>
    %cst_18 = arith.constant dense<0xFF800000> : vector<128xf32>
    %49 = vector.multi_reduction <maximumf>, %48, %cst_18 [1] : vector<128x128xf32> to vector<128xf32>
    %50 = vector.shape_cast %49 : vector<128xf32> to vector<128x1xf32>
    %51 = vector.shape_cast %46 : vector<128x1xf32> to vector<128x1xf32>
    %52 = vector.broadcast %51 : vector<128x1xf32> to vector<128x128xf32>
    %53 = vector.shape_cast %50 : vector<128x1xf32> to vector<128x1xf32>
    %54 = vector.broadcast %53 : vector<128x1xf32> to vector<128x128xf32>
    %55 = arith.select %42, %52, %54 : vector<128x128xi1>, vector<128x128xf32>
    %56 = arith.subf %25, %55 : vector<128x128xf32>
    %57 = math.exp %56 : vector<128x128xf32>
    %cst_19 = arith.constant 0.000000e+00 : f32
    %58 = vector.broadcast %cst_19 : f32 to vector<128x128xf32>
    %59 = arith.select %42, %57, %58 : vector<128x128xi1>, vector<128x128xf32>
    %cst_20 = arith.constant dense<0.000000e+00> : vector<128xf32>
    %60 = vector.multi_reduction <add>, %59, %cst_20 [1] : vector<128x128xf32> to vector<128xf32>
    %61 = vector.shape_cast %60 : vector<128xf32> to vector<128x1xf32>
    %cst_21 = arith.constant 0.000000e+00 : f32
    %62 = vector.broadcast %cst_21 : f32 to vector<128x128xf32>
    %63 = arith.select %42, %62, %57 : vector<128x128xi1>, vector<128x128xf32>
    %cst_22 = arith.constant dense<0.000000e+00> : vector<128xf32>
    %64 = vector.multi_reduction <add>, %63, %cst_22 [1] : vector<128x128xf32> to vector<128xf32>
    %65 = vector.shape_cast %64 : vector<128xf32> to vector<128x1xf32>
    %66 = math.log %61 : vector<128x1xf32>
    %67 = arith.addf %46, %66 : vector<128x1xf32>
    %68 = arith.addf %67, %50 : vector<128x1xf32>
    %69 = math.log %65 : vector<128x1xf32>
    %70 = arith.addf %68, %69 : vector<128x1xf32>
    %71 = vector.broadcast %28 : vector<128x1xi32> to vector<128x128xi32>
    %72 = arith.cmpi eq, %40, %71 : vector<128x128xi32>
    %73 = vector.broadcast %34 : vector<128x1xi32> to vector<128x128xi32>
    %74 = arith.cmpi eq, %40, %73 : vector<128x128xi32>
    %75 = arith.ori %72, %74 : vector<128x128xi1>
    %cst_23 = arith.constant 0.000000e+00 : f32
    %76 = vector.broadcast %cst_23 : f32 to vector<128x128xf32>
    %77 = arith.select %75, %25, %76 : vector<128x128xi1>, vector<128x128xf32>
    %cst_24 = arith.constant dense<0.000000e+00> : vector<128xf32>
    %78 = vector.multi_reduction <add>, %77, %cst_24 [1] : vector<128x128xf32> to vector<128xf32>
    %79 = vector.shape_cast %78 : vector<128xf32> to vector<128x1xf32>
    %80 = arith.subf %70, %79 : vector<128x1xf32>
    %81 = arith.mulf %39, %80 : vector<128x1xf32>
    %c24_i32 = arith.constant 24 : i32
    %82 = vector.broadcast %c24_i32 : i32 to vector<128x128xi32>
    %83 = arith.cmpi eq, %40, %82 : vector<128x128xi32>
    %84 = vector.shape_cast %81 : vector<128x1xf32> to vector<128x1xf32>
    %85 = vector.broadcast %84 : vector<128x1xf32> to vector<128x128xf32>
    %86 = arith.select %83, %85, %25 : vector<128x128xi1>, vector<128x128xf32>
    %c0_25 = arith.constant 0 : index
    %c0_26 = arith.constant 0 : index
    %87 = vector.load %arg5[%c0_25, %c0_26] : memref<128x128xf32, #tpu.memory_space<vmem>>, vector<128x128xf32>
    tpu.vector_store %arg5[%c0_25, %c0_26], %86 {strides = array<i32>} : memref<128x128xf32, #tpu.memory_space<vmem>>, vector<128x128xf32>,
    return
  }
  func.func @transform_0(%arg0: i32) -> (i32, i32) {
    %c0_i32 = arith.constant 0 : i32
    %c0_i32_0 = arith.constant 0 : i32
    return %arg0, %c0_i32 : i32, i32
  }
  func.func @transform_1(%arg0: i32) -> (i32, i32) {
    %c0_i32 = arith.constant 0 : i32
    %c0_i32_0 = arith.constant 0 : i32
    %c0_i32_1 = arith.constant 0 : i32
    return %c0_i32, %c0_i32_0 : i32, i32
  }
  func.func @transform_2(%arg0: i32) -> (i32, i32) {
    %c0_i32 = arith.constant 0 : i32
    %c0_i32_0 = arith.constant 0 : i32
    %c0_i32_1 = arith.constant 0 : i32
    return %c0_i32, %c0_i32_0 : i32, i32
  }
  func.func @transform_3(%arg0: i32) -> (i32, i32) {
    %c0_i32 = arith.constant 0 : i32
    %c0_i32_0 = arith.constant 0 : i32
    return %arg0, %c0_i32 : i32, i32
  }
  func.func @transform_4(%arg0: i32) -> (i32, i32) {
    %c0_i32 = arith.constant 0 : i32
    %c0_i32_0 = arith.constant 0 : i32
    return %arg0, %c0_i32 : i32, i32
  }
}

</mosaic_0001>

<bundles_post_ra>
// kernel: model_forward.1
= control target key start
LH: loop header
LB: loop body
LE: loop exit
PB: predicated region body
PF: predicated region fallthrough
CT: control target
= control target key end

     0   :  { %s1841_s15 = smov 0   ;;  %s2761_s0 = inlined_call_operand.vmem [shape: bf16[256,32], index: 0, kind: input, shape index: {}]   ;;  %s2762_s1 = inlined_call_operand.vmem [shape: bf16[32,128], index: 1, kind: input, shape index: {}]   ;;  %s2763_s2 = inlined_call_operand.vmem [shape: f32[1,128], index: 2, kind: input, shape index: {}]   ;;  %s2764_s3 = inlined_call_operand.vmem [shape: s32[256,1], index: 3, kind: input, shape index: {}]   ;;  %s2765_s4 = inlined_call_operand.vmem [shape: f32[256,128], index: 4, kind: output, shape index: {}]  }
   0x1 LB: > { %s1553_s16 = sadd.s32 4294967295, %s1813_s15   ;;  %p1557_p0 = scmp.ge.s32.totalorder %s1813_s15, 1  ;;  %s1813_s15 = sphi %s1841_s15, %s14_s15  }
   0x2   : > { %p174_p1 = scmp.lt.s32.totalorder %s1813_s15, 3 }
   0x4   : > { %p175_p2 = pnand %p1557_p0, %p174_p1 }
   0x6   : > { %178 = sbr.rel (%p175_p2) target bundleno = 961 (0x3c1), region = 36 }
   0xd   : > { %s1558_s17 = sshll.u32 %s1553_s16, 4  ;;  %vm256_vm0 = vcmask 261120  }
   0xe   : > { %p206_p3 = scmp.lt.s32.totalorder %s1558_s17, 31 }
  0x10   : > { %s2826_s17 = smov (!%p206_p3, %s1558_s17), 31 }
  0x11   : > { %s1559_s18 = sshll.u32 %s2826_s17, 2  ;;  %s1561_s26 = sshll.u32 %s2826_s17, 3 }
  0x12   : > { %s1855_s21 = scalar_lea.vmem %s2761_s0, %s1559_s18  ;;  %s1989_s29 = scalar_lea.vmem %s2764_s3, %s1561_s26 }
  0x13   : > { %v1612_v0 = vld [vmem:[%s1855_s21 + $0x20] sm:$0xff]   ;;  %v1609_v6 = vld [vmem:[%s1855_s21 + $0x8] sm:$0xff]   ;;  %v1610_v34 = vld [vmem:[%s1855_s21 + $0x10] sm:$0xff]   ;;  %s2692_s8 = scalar_lea.vmem %s2765_s4, %s1561_s26 }
  0x14   : > { %v1578_v1 = vld [vmem:[%s1855_s21] sm:$0xff]   ;;  %v1859_v2 = vunpack.c.l.bf16 %v1612_v0  ;;  %v1863_v4 = vunpack.c.h.bf16 %v1612_v0  ;;  %v1876_v11 = vunpack.c.h.bf16 %v1609_v6  ;;  %v1878_v12 = vunpack.c.l.bf16 %v1609_v6  ;;  %v1613_v13 = vld [vmem:[%s1855_s21 + $0x28] sm:$0xff]   ;;  %v1614_v39 = vld [vmem:[%s1855_s21 + $0x30] sm:$0xff]  }
  0x15   : > { %v1861_v3 = vunpack.c.l.bf16 %v1578_v1  ;;  %v1865_v5 = vunpack.c.h.bf16 %v1578_v1  ;;  %v1885_v16 = vunpack.c.h.bf16 %v1613_v13  ;;  %v1887_v17 = vunpack.c.l.bf16 %v1613_v13  ;;  %v1611_v44 = vld [vmem:[%s1855_s21 + $0x18] sm:$0xff]   ;;  %v1661_v6 = vld [vmem:[%s2762_s1] sm:$0xff]   ;;  %v1662_v13 = vld [vmem:[%s2762_s1 + $0x8] sm:$0xff]  }
  0x16   : > { %v281_v7 = vsel %vm256_vm0, %v1859_v2, 0.0  ;;  %v284_v9 = vsel %vm256_vm0, %v1863_v4, 0.0  ;;  %v266_v14 = vsel %vm256_vm0, %v1876_v11, 0.0  ;;  %v263_v15 = vsel %vm256_vm0, %v1878_v12, 0.0  ;;  %v1615_v49 = vld [vmem:[%s1855_s21 + $0x38] sm:$0xff]   ;;  %1626 = vmatprep.subr.bf16.mxu0 %v1661_v6  ;;  %1646 = vmatprep.subr.bf16.mxu1 %v1661_v6 }
  0x17   : > { %v257_v8 = vsel %vm256_vm0, %v1861_v3, 0.0  ;;  %282 = vadd.xlane.f32.xlu1 %v281_v7  ;;  %v260_v10 = vsel %vm256_vm0, %v1865_v5, 0.0  ;;  %v290_v18 = vsel %vm256_vm0, %v1885_v16, 0.0  ;;  %v287_v19 = vsel %vm256_vm0, %v1887_v17, 0.0  ;;  %1627 = vmatpush3.bf16.msra.mxu0 %v1661_v6 }
  0x18   : > { %258 = vadd.xlane.f32.xlu0 %v257_v8  ;;  %v322_v20 = vmul.f32 %v1865_v5, %v1865_v5  ;;  %v321_v21 = vmul.f32 %v1861_v3, %v1861_v3  ;;  %v330_v24 = vmul.f32 %v1863_v4, %v1863_v4  ;;  %v329_v25 = vmul.f32 %v1859_v2, %v1859_v2 }
  0x19   : > { %v324_v28 = vmul.f32 %v1876_v11, %v1876_v11  ;;  %v323_v29 = vmul.f32 %v1878_v12, %v1878_v12  ;;  %v332_v32 = vmul.f32 %v1885_v16, %v1885_v16  ;;  %v331_v33 = vmul.f32 %v1887_v17, %v1887_v17  ;;  %1648 = vmatpush3.bf16.msra.mxu1 %v1661_v6 }
  0x1a   : > { %v340_v22 = vsel %vm256_vm0, %v322_v20, 0.0  ;;  %v337_v23 = vsel %vm256_vm0, %v321_v21, 0.0  ;;  %v364_v26 = vsel %vm256_vm0, %v330_v24, 0.0  ;;  %v361_v27 = vsel %vm256_vm0, %v329_v25, 0.0  ;;  %1628 = vmatprep.subr.bf16.mxu0 %v1662_v13  ;;  %1647 = vmatprep.subr.bf16.mxu1 %v1662_v13  ;;  %v651_v21 = vld [vmem:[%s1989_s29 + $0x10] sm:$0xff]  ;;  %v653_v25 = vld [vmem:[%s1989_s29 + $0x20] sm:$0xff] }
  0x1b   : > { %285 = vadd.xlane.f32.xlu1 %v284_v9  ;;  %v346_v30 = vsel %vm256_vm0, %v324_v28, 0.0  ;;  %v343_v31 = vsel %vm256_vm0, %v323_v29, 0.0  ;;  %v370_v35 = vsel %vm256_vm0, %v332_v32, 0.0  ;;  %v367_v36 = vsel %vm256_vm0, %v331_v33, 0.0  ;;  %1629 = vmatpush3.bf16.msra.mxu0 %v1662_v13  ;;  %v655_v29 = vld [vmem:[%s1989_s29 + $0x30] sm:$0xff]  ;;  %v658_v32 = vld [vmem:[%s1989_s29 + $0x48] sm:$0xff] }
  0x1c   : > { %261 = vadd.xlane.f32.xlu0 %v260_v10  ;;  %v1918_v37 = vunpack.c.h.bf16 %v1610_v34  ;;  %v1920_v38 = vunpack.c.l.bf16 %v1610_v34  ;;  %v1927_v42 = vunpack.c.h.bf16 %v1614_v39  ;;  %v1929_v43 = vunpack.c.l.bf16 %v1614_v39 }
  0x1d   : > { %v1936_v47 = vunpack.c.h.bf16 %v1611_v44  ;;  %v1938_v48 = vunpack.c.l.bf16 %v1611_v44  ;;  %v1945_v52 = vunpack.c.h.bf16 %v1615_v49  ;;  %v1947_v53 = vunpack.c.l.bf16 %v1615_v49  ;;  %1649 = vmatpush3.bf16.msra.mxu1 %v1662_v13  ;;  %v662_v44 = vld [vmem:[%s1989_s29 + $0x68] sm:$0xff] }
  0x1e   : > { %v272_v40 = vsel %vm256_vm0, %v1918_v37, 0.0  ;;  %v269_v41 = vsel %vm256_vm0, %v1920_v38, 0.0  ;;  %v296_v45 = vsel %vm256_vm0, %v1927_v42, 0.0  ;;  %v293_v46 = vsel %vm256_vm0, %v1929_v43, 0.0 }
  0x1f   : > { %267 = vadd.xlane.f32.xlu1 %v266_v14  ;;  %v278_v50 = vsel %vm256_vm0, %v1936_v47, 0.0  ;;  %v275_v51 = vsel %vm256_vm0, %v1938_v48, 0.0  ;;  %v302_v54 = vsel %vm256_vm0, %v1945_v52, 0.0  ;;  %v299_v55 = vsel %vm256_vm0, %v1947_v53, 0.0 }
  0x20   : > { %264 = vadd.xlane.f32.xlu0 %v263_v15  ;;  %v326_v56 = vmul.f32 %v1918_v37, %v1918_v37  ;;  %v325_v57 = vmul.f32 %v1920_v38, %v1920_v38  ;;  %v334_v60 = vmul.f32 %v1927_v42, %v1927_v42  ;;  %v333_v61 = vmul.f32 %v1929_v43, %v1929_v43 }
  0x21   : > { %v328_v0 = vmul.f32 %v1936_v47, %v1936_v47  ;;  %v327_v1 = vmul.f32 %v1938_v48, %v1938_v48  ;;  %v336_v9 = vmul.f32 %v1945_v52, %v1945_v52  ;;  %v335_v10 = vmul.f32 %v1947_v53, %v1947_v53 }
  0x22   : > { %v352_v58 = vsel %vm256_vm0, %v326_v56, 0.0  ;;  %v349_v59 = vsel %vm256_vm0, %v325_v57, 0.0  ;;  %v376_v62 = vsel %vm256_vm0, %v334_v60, 0.0  ;;  %v373_v63 = vsel %vm256_vm0, %v333_v61, 0.0  ;;  %v2010_v60 = vld [vmem:[%s1989_s29 + $0x70] sm:$0xff] }
  0x23   : > { %291 = vadd.xlane.f32.xlu1 %v290_v18  ;;  %v358_v7 = vsel %vm256_vm0, %v328_v0, 0.0  ;;  %v355_v8 = vsel %vm256_vm0, %v327_v1, 0.0  ;;  %v382_v14 = vsel %vm256_vm0, %v336_v9, 0.0  ;;  %v379_v15 = vsel %vm256_vm0, %v335_v10, 0.0  ;;  %v650_v18 = vld [vmem:[%s1989_s29 + $0x8] sm:$0xff] }
  0x24   : > { %288 = vadd.xlane.f32.xlu0 %v287_v19  ;;  %v1815_v19 = vmov 0   ;;  %v666_v20 = vand.u32 255, %v650_v18  ;;  %v671_v33 = vand.u32 255, %v655_v29  ;;  %v674_v34 = vand.u32 255, %v658_v32 }
  0x25   : > { %1660 = vset.pattern.permute.xlu1 %v1815_v19  ;;  %1659 = vset.pattern.permute.xlu0 %v1815_v19  ;;  %v682_v49 = vshra.s32 %v650_v18, 8  ;;  %v679_v1 = vand.u32 255, %v2010_v60  ;;  %v683_v6 = vshra.s32 %v651_v21, 8 }
  0x27   : > { %341 = vadd.xlane.f32.xlu1 %v340_v22  ;;  %v667_v22 = vand.u32 255, %v651_v21  ;;  %v698_v57 = vand.u32 255, %v682_v49  ;;  %v699_v13 = vand.u32 255, %v683_v6 }
  0x28   : > { %338 = vadd.xlane.f32.xlu0 %v337_v23  ;;  %v652_v23 = vld [vmem:[%s1989_s29 + $0x18] sm:$0xff] }
  0x29   : > { %v668_v24 = vand.u32 255, %v652_v23 }
  0x2b   : > { %365 = vadd.xlane.f32.xlu1 %v364_v26  ;;  %v669_v26 = vand.u32 255, %v653_v25 }
  0x2c   : > { %362 = vadd.xlane.f32.xlu0 %v361_v27  ;;  %v654_v27 = vld [vmem:[%s1989_s29 + $0x28] sm:$0xff] }
  0x2d   : > { %v670_v28 = vand.u32 255, %v654_v27  ;;  %v686_v0 = vshra.s32 %v654_v27, 8 }
  0x2f   : > { %347 = vadd.xlane.f32.xlu1 %v346_v30  ;;  %v649_v30 = vld [vmem:[%s1989_s29] sm:$0xff]  ;;  %v702_v9 = vand.u32 255, %v686_v0 }
  0x30   : > { %344 = vadd.xlane.f32.xlu0 %v343_v31  ;;  %v665_v31 = vand.u32 255, %v649_v30  ;;  %v681_v61 = vshra.s32 %v649_v30, 8 }
  0x31   : > { %v718_v18 = vadd.s32 16, %v702_v9 }
  0x33   : > { %371 = vadd.xlane.f32.xlu1 %v370_v35  ;;  %v656_v35 = vld [vmem:[%s1989_s29 + $0x38] sm:$0xff] }
  0x34   : > { %368 = vadd.xlane.f32.xlu0 %v367_v36  ;;  %v660_v36 = vld [vmem:[%s1989_s29 + $0x58] sm:$0xff]  ;;  %v672_v39 = vand.u32 255, %v656_v35  ;;  %v688_v10 = vshra.s32 %v656_v35, 8 }
  0x35   : > { %v692_v27 = vshra.s32 %v660_v36, 8 }
  0x36   : > { %v704_v19 = vand.u32 255, %v688_v10 }
  0x37   : > { %273 = vadd.xlane.f32.xlu1 %v272_v40  ;;  %v676_v40 = vand.u32 255, %v660_v36 }
  0x38   : > { %270 = vadd.xlane.f32.xlu0 %v269_v41  ;;  %v657_v41 = vld [vmem:[%s1989_s29 + $0x40] sm:$0xff]  ;;  %v720_v21 = vadd.s32 16, %v704_v19 }
  0x3b   : > { %297 = vadd.xlane.f32.xlu1 %v296_v45  ;;  %v673_v45 = vand.u32 255, %v657_v41 }
  0x3c   : > { %294 = vadd.xlane.f32.xlu0 %v293_v46  ;;  %v678_v46 = vand.u32 255, %v662_v44 }
  0x3f   : > { %279 = vadd.xlane.f32.xlu1 %v278_v50  ;;  %v659_v50 = vld [vmem:[%s1989_s29 + $0x50] sm:$0xff] }
  0x40   : > { %276 = vadd.xlane.f32.xlu0 %v275_v51  ;;  %v2005_v51 = vld [vmem:[%s1989_s29 + $0x78] sm:$0xff] }
  0x41   : > { %v680_v56 = vand.u32 255, %v2005_v51 }
  0x43   : > { %303 = vadd.xlane.f32.xlu1 %v302_v54  ;;  %v675_v54 = vand.u32 255, %v659_v50 }
  0x44   : > { %300 = vadd.xlane.f32.xlu0 %v299_v55  ;;  %v661_v55 = vld [vmem:[%s1989_s29 + $0x60] sm:$0xff] }
  0x45   : > { %v693_v36 = vshra.s32 %v661_v55, 8 }
  0x47   : > { %353 = vadd.xlane.f32.xlu1 %v352_v58  ;;  %v684_v58 = vshra.s32 %v652_v23, 8  ;;  %v687_v23 = vshra.s32 %v655_v29, 8 }
  0x48   : > { %350 = vadd.xlane.f32.xlu0 %v349_v59  ;;  %v677_v59 = vand.u32 255, %v661_v55 }
  0x4b   : > { %377 = vadd.xlane.f32.xlu1 %v376_v62  ;;  %v714_v62 = vadd.s32 16, %v698_v57  ;;  %v709_v57 = vand.u32 255, %v693_v36 }
  0x4c   : > { %374 = vadd.xlane.f32.xlu0 %v373_v63  ;;  %v700_v63 = vand.u32 255, %v684_v58 }
  0x4f   : > { %359 = vadd.xlane.f32.xlu1 %v358_v7  ;;  %v697_v7 = vand.u32 255, %v681_v61 }
  0x50   : > { %356 = vadd.xlane.f32.xlu0 %v355_v8  ;;  %v716_v8 = vadd.s32 16, %v700_v63 }
  0x53   : > { %383 = vadd.xlane.f32.xlu1 %v382_v14  ;;  %v685_v14 = vshra.s32 %v653_v25, 8 }
  0x54   : > { %380 = vadd.xlane.f32.xlu0 %v379_v15  ;;  %v713_v15 = vadd.s32 16, %v697_v7 }
  0x64   : > { %1152 = vperm.xlu1 %1660, %v666_v20   ;;  %v690_v20 = vshra.s32 %v658_v32, 8  ;;  %v691_v32 = vshra.s32 %v659_v50, 8 }
  0x68   : > { %1155 = vperm.xlu1 %1660, %v667_v22   ;;  %v715_v22 = vadd.s32 16, %v699_v13 }
  0x6a   : > { %1149 = vperm.xlu0 %1659, %v665_v31   ;;  %v689_v31 = vshra.s32 %v657_v41, 8 }
  0x6c   : > { %1158 = vperm.xlu1 %1660, %v668_v24   ;;  %v701_v24 = vand.u32 255, %v685_v14 }
  0x6e   : > { %1176 = vperm.xlu0 %1659, %v674_v34   ;;  %v717_v30 = vadd.s32 16, %v701_v24  ;;  %v694_v34 = vshra.s32 %v662_v44, 8 }
  0x70   : > { %1161 = vperm.xlu1 %1660, %v669_v26   ;;  %v706_v26 = vand.u32 255, %v690_v20 }
  0x72   : > { %1182 = vperm.xlu0 %1659, %v676_v40   ;;  %v722_v25 = vadd.s32 16, %v706_v26  ;;  %v710_v40 = vand.u32 255, %v694_v34 }
  0x74   : > { %1164 = vperm.xlu1 %1660, %v670_v28   ;;  %v703_v28 = vand.u32 255, %v687_v23 }
  0x76   : > { %1188 = vperm.xlu0 %1659, %v678_v46   ;;  %v719_v35 = vadd.s32 16, %v703_v28  ;;  %v707_v46 = vand.u32 255, %v691_v32 }
  0x78   : > { %1167 = vperm.xlu1 %1660, %v671_v33   ;;  %v708_v33 = vand.u32 255, %v692_v27  ;;  %v723_v41 = vadd.s32 16, %v707_v46 }
  0x7a   : > { %1194 = vperm.xlu0 %1659, %v680_v56   ;;  %v724_v29 = vadd.s32 16, %v708_v33  ;;  %v726_v56 = vadd.s32 16, %v710_v40 }
  0x7c   : > { %1170 = vperm.xlu1 %1660, %v672_v39   ;;  %v705_v39 = vand.u32 255, %v689_v31 }
  0x7e   : > { %1216 = vperm.xlu0 %1659, %v714_v62  }
  0x80   : > { %1173 = vperm.xlu1 %1660, %v673_v45   ;;  %v721_v45 = vadd.s32 16, %v705_v39 }
  0x82   : > { %1222 = vperm.xlu0 %1659, %v716_v8  }
  0x84   : > { %1179 = vperm.xlu1 %1660, %v675_v54  }
  0x86   : > { %1228 = vperm.xlu0 %1659, %v718_v18  }
  0x88   : > { %1185 = vperm.xlu1 %1660, %v677_v59   ;;  %v725_v59 = vadd.s32 16, %v709_v57 }
  0x8a   : > { %1234 = vperm.xlu0 %1659, %v720_v21  }
  0x8c   : > { %1191 = vperm.xlu1 %1660, %v679_v1  }
  0x8e   : > { %1240 = vperm.xlu0 %1659, %v722_v25  }
  0x90   : > { %1213 = vperm.xlu1 %1660, %v713_v15  }
  0x92   : > { %1246 = vperm.xlu0 %1659, %v724_v29  }
  0x94   : > { %1219 = vperm.xlu1 %1660, %v715_v22  }
  0x96   : > { %1252 = vperm.xlu0 %1659, %v726_v56  }
  0x98   : > { %1225 = vperm.xlu1 %1660, %v717_v30  }
  0x9c   : > { %1231 = vperm.xlu1 %1660, %v719_v35  }
  0xa0   : > { %1237 = vperm.xlu1 %1660, %v721_v45  }
  0xa4   : > { %v283_v49 = vpop.xlane.xlu1 %282  ;;  %1243 = vperm.xlu1 %1660, %v723_v41  }
  0xa5   : > { %v259_v54 = vpop.xlane.xlu0 %258  ;;  %v2015_v55 = vmul.f32 0.03125, %v283_v49 }
  0xa6   : > { %v2013_v0 = vmul.f32 0.03125, %v259_v54 }
  0xa7   : > { %v409_v20 = vmul.f32 %v2015_v55, %v2015_v55 }
  0xa8   : > { %v286_v58 = vpop.xlane.xlu1 %285  ;;  %1249 = vperm.xlu1 %1660, %v725_v59   ;;  %v401_v9 = vmul.f32 %v2013_v0, %v2013_v0 }
  0xa9   : > { %v262_v44 = vpop.xlane.xlu0 %261  ;;  %v2017_v6 = vmul.f32 0.03125, %v286_v58 }
  0xaa   : > { %v306_v1 = vmul.f32 0.03125, %v262_v44 }
  0xab   : > { %v410_v22 = vmul.f32 %v2017_v6, %v2017_v6 }
  0xac   : > { %v268_v61 = vpop.xlane.xlu1 %267  ;;  %v402_v10 = vmul.f32 %v306_v1, %v306_v1 }
  0xad   : > { %v265_v50 = vpop.xlane.xlu0 %264  ;;  %v2021_v15 = vmul.f32 0.03125, %v268_v61 }
  0xae   : > { %v2027_v23 = vmul.f32 0.03125, %v265_v50 }
  0xaf   : > { %v404_v31 = vmul.f32 %v2021_v15, %v2021_v15 }
  0xb0   : > { %v292_v62 = vpop.xlane.xlu1 %291  ;;  %v403_v34 = vmul.f32 %v2027_v23, %v2027_v23 }
  0xb1   : > { %v289_v63 = vpop.xlane.xlu0 %288  ;;  %v2033_v35 = vmul.f32 0.03125, %v292_v62 }
  0xb2   : > { %v2035_v39 = vmul.f32 0.03125, %v289_v63 }
  0xb3   : > { %v412_v56 = vmul.f32 %v2033_v35, %v2033_v35 }
  0xb4   : > { %v342_v7 = vpop.xlane.xlu1 %341  ;;  %v411_v41 = vmul.f32 %v2035_v39, %v2035_v39 }
  0xb5   : > { %v339_v8 = vpop.xlane.xlu0 %338  ;;  %v386_v13 = vmul.f32 0.03125, %v342_v7  ;;  %v434_v7 = vsub.f32 %v1865_v5, %v306_v1 }
  0xb6   : > { %v385_v14 = vmul.f32 0.03125, %v339_v8 }
  0xb7   : > { %v418_v18 = vsub.f32 %v386_v13, %v402_v10 }
  0xb8   : > { %v417_v19 = vsub.f32 %v385_v14, %v401_v9  ;;  %v366_v24 = vpop.xlane.xlu1 %365 }
  0xb9   : > { %v363_v21 = vpop.xlane.xlu0 %362  ;;  %v450_v26 = vadd.f32 1e-05, %v418_v18  ;;  %v394_v28 = vmul.f32 0.03125, %v366_v24 }
  0xba   : > { %v449_v27 = vadd.f32 1e-05, %v417_v19  ;;  %v393_v30 = vmul.f32 0.03125, %v363_v21  ;;  %v433_v19 = vsub.f32 %v1861_v3, %v2013_v0 }
  0xbb   : > { %1663 = vrsqrt.f32 %v450_v26  ;;  %v426_v25 = vsub.f32 %v394_v28, %v410_v22  ;;  %v442_v22 = vsub.f32 %v1863_v4, %v2017_v6 }
  0xbc   : > { %v425_v33 = vsub.f32 %v393_v30, %v409_v20  ;;  %1665 = vrsqrt.f32 %v449_v27  ;;  %v348_v32 = vpop.xlane.xlu1 %347  ;;  %v441_v27 = vsub.f32 %v1859_v2, %v2015_v55  ;;  %v444_v2 = vsub.f32 %v1885_v16, %v2033_v35 }
  0xbd   : > { %v345_v29 = vpop.xlane.xlu0 %344  ;;  %v458_v40 = vadd.f32 1e-05, %v426_v25  ;;  %v388_v46 = vmul.f32 0.03125, %v348_v32 }
  0xbe   : > { %v457_v45 = vadd.f32 1e-05, %v425_v33  ;;  %v387_v36 = vmul.f32 0.03125, %v345_v29  ;;  %v435_v33 = vsub.f32 %v1878_v12, %v2027_v23 }
  0xbf   : > { %1667 = vrsqrt.f32 %v458_v40  ;;  %v420_v49 = vsub.f32 %v388_v46, %v404_v31  ;;  %v436_v31 = vsub.f32 %v1876_v11, %v2021_v15 }
  0xc0   : > { %v419_v54 = vsub.f32 %v387_v36, %v403_v34  ;;  %1669 = vrsqrt.f32 %v457_v45  ;;  %v372_v57 = vpop.xlane.xlu1 %371  ;;  %v443_v36 = vsub.f32 %v1887_v17, %v2035_v39 }
  0xc1   : > { %v369_v58 = vpop.xlane.xlu0 %368  ;;  %v452_v44 = vadd.f32 1e-05, %v420_v49  ;;  %v396_v61 = vmul.f32 0.03125, %v372_v57 }
  0xc2   : > { %v451_v59 = vadd.f32 1e-05, %v419_v54  ;;  %v395_v50 = vmul.f32 0.03125, %v369_v58 }
  0xc3   : > { %1671 = vrsqrt.f32 %v452_v44  ;;  %v428_v62 = vsub.f32 %v396_v61, %v412_v56 }
  0xc4   : > { %v427_v63 = vsub.f32 %v395_v50, %v411_v41  ;;  %1673 = vrsqrt.f32 %v451_v59  ;;  %v274_v8 = vpop.xlane.xlu1 %273 }
  0xc5   : > { %v271_v9 = vpop.xlane.xlu0 %270  ;;  %v1664_v10 = vpop.eup %1663  ;;  %v460_v13 = vadd.f32 1e-05, %v428_v62  ;;  %v2056_v40 = vmul.f32 0.03125, %v274_v8 }
  0xc6   : > { %v459_v14 = vadd.f32 1e-05, %v427_v63  ;;  %v1666_v18 = vpop.eup %1665  ;;  %v482_v20 = vmul.f32 %v1664_v10, %v434_v7  ;;  %v2058_v45 = vmul.f32 0.03125, %v271_v9 }
  0xc7   : > { %1675 = vrsqrt.f32 %v460_v13  ;;  %v481_v26 = vmul.f32 %v1666_v18, %v433_v19  ;;  %v406_v41 = vmul.f32 %v2056_v40, %v2056_v40 }
  0xc8   : > { %1677 = vrsqrt.f32 %v459_v14  ;;  %v298_v24 = vpop.xlane.xlu1 %297  ;;  %v405_v57 = vmul.f32 %v2058_v45, %v2058_v45 }
  0xc9   : > { %v295_v21 = vpop.xlane.xlu0 %294  ;;  %v1668_v5 = vpop.eup %1667  ;;  %v497_v28 = vpack.c.bf16 %v482_v20, %v481_v26  ;;  %v2062_v49 = vmul.f32 0.03125, %v298_v24 }
  0xca   : > { %v1670_v1 = vpop.eup %1669  ;;  %v490_v30 = vmul.f32 %v1668_v5, %v442_v22  ;;  %v2064_v54 = vmul.f32 0.03125, %v295_v21 }
  0xcb   : > { %1630 = vmatprep.mubr.msk.bf16.mxu0 %vm256_vm0, %v497_v28  ;;  %v489_v25 = vmul.f32 %v1670_v1, %v441_v27  ;;  %v414_v50 = vmul.f32 %v2062_v49, %v2062_v49 }
  0xcc   : > { %v280_v3 = vpop.xlane.xlu1 %279  ;;  %v413_v62 = vmul.f32 %v2064_v54, %v2064_v54 }
  0xcd   : > { %v277_v0 = vpop.xlane.xlu0 %276  ;;  %v1672_v4 = vpop.eup %1671  ;;  %v501_v34 = vpack.c.bf16 %v490_v30, %v489_v25  ;;  %v2071_v39 = vmul.f32 0.03125, %v280_v3 }
  0xce   : > { %v1674_v6 = vpop.eup %1673  ;;  %v484_v32 = vmul.f32 %v1672_v4, %v436_v31  ;;  %v2077_v63 = vmul.f32 0.03125, %v277_v0 }
  0xcf   : > { %1638 = vmatprep.mubr.msk.bf16.mxu1 %vm256_vm0, %v501_v34  ;;  %v483_v11 = vmul.f32 %v1674_v6, %v435_v33  ;;  %v408_v18 = vmul.f32 %v2071_v39, %v2071_v39 }
  0xd0   : > { %v304_v55 = vpop.xlane.xlu1 %303  ;;  %v407_v22 = vmul.f32 %v2077_v63, %v2077_v63 }
  0xd1   : > { %v301_v29 = vpop.xlane.xlu0 %300  ;;  %v1676_v15 = vpop.eup %1675  ;;  %v498_v12 = vpack.c.bf16 %v484_v32, %v483_v11  ;;  %v320_v24 = vmul.f32 0.03125, %v304_v55  ;;  %v438_v11 = vsub.f32 %v1918_v37, %v2056_v40 }
  0xd2   : > { %v1678_v46 = vpop.eup %1677  ;;  %v492_v23 = vmul.f32 %v1676_v15, %v444_v2  ;;  %v319_v21 = vmul.f32 0.03125, %v301_v29 }
  0xd3   : > { %1631 = vmatmul.mubr.msk.bf16.vlgmr.msra.gmra.mrb[0].mxu0 %vm256_vm0, %v498_v12  ;;  %v491_v56 = vmul.f32 %v1678_v46, %v443_v36  ;;  %v416_v0 = vmul.f32 %v320_v24, %v320_v24  ;;  %v437_v46 = vsub.f32 %v1920_v38, %v2058_v45  ;;  %v440_v45 = vsub.f32 %v1936_v47, %v2071_v39 }
  0xd4   : > { %v354_v16 = vpop.xlane.xlu1 %353  ;;  %v415_v25 = vmul.f32 %v319_v21, %v319_v21 }
  0xd5   : > { %v351_v35 = vpop.xlane.xlu0 %350  ;;  %v390_v58 = vmul.f32 0.03125, %v354_v16  ;;  %v502_v17 = vpack.c.bf16 %v492_v23, %v491_v56  ;;  %v446_v56 = vsub.f32 %v1927_v42, %v2062_v49 }
  0xd6   : > { %v389_v44 = vmul.f32 0.03125, %v351_v35 }
  0xd7   : > { %v422_v59 = vsub.f32 %v390_v58, %v406_v41  ;;  %1639 = vmatmul.mubr.msk.bf16.vlgmr.msra.gmra.mrb[0].mxu1 %vm256_vm0, %v502_v17  ;;  %v439_v17 = vsub.f32 %v1938_v48, %v2077_v63  ;;  %v777_v48 = vlaneseq }
  0xd8   : > { %v421_v61 = vsub.f32 %v389_v44, %v405_v57  ;;  %v378_v7 = vpop.xlane.xlu1 %377  ;;  %v445_v57 = vsub.f32 %v1929_v43, %v2064_v54  ;;  %v448_v43 = vsub.f32 %v1945_v52, %v320_v24 }
  0xd9   : > { %v375_v8 = vpop.xlane.xlu0 %374  ;;  %v454_v9 = vadd.f32 1e-05, %v422_v59  ;;  %v398_v13 = vmul.f32 0.03125, %v378_v7  ;;  %v2102_v63 = vand.u32 127, %v777_v48 }
  0xda   : > { %v453_v10 = vadd.f32 1e-05, %v421_v61  ;;  %v397_v14 = vmul.f32 0.03125, %v375_v8 }
  0xdb   : > { %1679 = vrsqrt.f32 %v454_v9  ;;  %v430_v19 = vsub.f32 %v398_v13, %v414_v50  ;;  %v447_v50 = vsub.f32 %v1947_v53, %v319_v21  ;;  %v2107_v9 = vld [vmem:[%s2763_s2] ss:$0 sm:$0xff]  ;;  %vm779_vm1 = vcmp.lt.s32.totalorder %v2102_v63, 16 }
  0xdc   : > { %v429_v20 = vsub.f32 %v397_v14, %v413_v62  ;;  %1681 = vrsqrt.f32 %v453_v10  ;;  %v360_v26 = vpop.xlane.xlu1 %359 }
  0xdd   : > { %v357_v5 = vpop.xlane.xlu0 %356  ;;  %v462_v1 = vadd.f32 1e-05, %v430_v19  ;;  %v392_v28 = vmul.f32 0.03125, %v360_v26 }
  0xde   : > { %v461_v27 = vadd.f32 1e-05, %v429_v20  ;;  %v391_v30 = vmul.f32 0.03125, %v357_v5 }
  0xdf   : > { %1683 = vrsqrt.f32 %v462_v1  ;;  %v424_v31 = vsub.f32 %v392_v28, %v408_v18 }
  0xe0   : > { %v423_v3 = vsub.f32 %v391_v30, %v407_v22  ;;  %1685 = vrsqrt.f32 %v461_v27  ;;  %v384_v4 = vpop.xlane.xlu1 %383 }
  0xe1   : > { %v381_v6 = vpop.xlane.xlu0 %380  ;;  %v456_v33 = vadd.f32 1e-05, %v424_v31  ;;  %v400_v32 = vmul.f32 0.03125, %v384_v4 }
  0xe2   : > { %v455_v34 = vadd.f32 1e-05, %v423_v3  ;;  %v399_v2 = vmul.f32 0.03125, %v381_v6 }
  0xe3   : > { %1687 = vrsqrt.f32 %v456_v33  ;;  %v432_v55 = vsub.f32 %v400_v32, %v416_v0 }
  0xe4   : > { %v431_v29 = vsub.f32 %v399_v2, %v415_v25  ;;  %1689 = vrsqrt.f32 %v455_v34 }
  0xe5   : > { %v1680_v15 = vpop.eup %1679  ;;  %v464_v36 = vadd.f32 1e-05, %v432_v55 }
  0xe6   : > { %v463_v12 = vadd.f32 1e-05, %v431_v29  ;;  %v1682_v23 = vpop.eup %1681  ;;  %v486_v16 = vmul.f32 %v1680_v15, %v438_v11 }
  0xe7   : > { %1691 = vrsqrt.f32 %v464_v36  ;;  %v485_v35 = vmul.f32 %v1682_v23, %v437_v46 }
  0xe8   : > { %1693 = vrsqrt.f32 %v463_v12 }
  0xe9   : > { %v1684_v41 = vpop.eup %1683  ;;  %v499_v37 = vpack.c.bf16 %v486_v16, %v485_v35 }
  0xea   : > { %v1686_v40 = vpop.eup %1685  ;;  %v494_v58 = vmul.f32 %v1684_v41, %v446_v56 }
  0xeb   : > { %1634 = vmatprep.mubr.msk.bf16.mxu0 %vm256_vm0, %v499_v37  ;;  %v493_v38 = vmul.f32 %v1686_v40, %v445_v57 }
  0xed   : > { %v1688_v44 = vpop.eup %1687  ;;  %v503_v59 = vpack.c.bf16 %v494_v58, %v493_v38  ;;  %v2197_v38 = vpop.permute.xlu1 %1152 }
  0xee   : > { %v1690_v42 = vpop.eup %1689  ;;  %v488_v49 = vmul.f32 %v1688_v44, %v440_v45  ;;  %vm1197_vm2 = vcmp.eq.s32.totalorder %v2102_v63, %v2197_v38 }
  0xef   : > { %1642 = vmatprep.mubr.msk.bf16.mxu1 %vm256_vm0, %v503_v59  ;;  %v487_v61 = vmul.f32 %v1690_v42, %v439_v17 }
  0xf1   : > { %v1692_v54 = vpop.eup %1691  ;;  %v500_v62 = vpack.c.bf16 %v488_v49, %v487_v61  ;;  %v2208_v49 = vpop.permute.xlu1 %1155 }
  0xf2   : > { %v1694_v7 = vpop.eup %1693  ;;  %v496_v8 = vmul.f32 %v1692_v54, %v448_v43  ;;  %vm1198_vm7 = vcmp.eq.s32.totalorder %v2102_v63, %v2208_v49 }
  0xf3   : > { %1635 = vmatmul.mubr.msk.bf16.gmra.mrb[4].mxu0 %vm256_vm0, %v500_v62  ;;  %v495_v47 = vmul.f32 %v1694_v7, %v447_v50 }
  0xf5   : > { %v504_v39 = vpack.c.bf16 %v496_v8, %v495_v47  ;;  %v2222_v62 = vpop.permute.xlu1 %1158 }
  0xf6   : > { %vm1199_vm10 = vcmp.eq.s32.totalorder %v2102_v63, %v2222_v62 }
  0xf7   : > { %1643 = vmatmul.mubr.msk.bf16.gmra.mrb[4].mxu1 %vm256_vm0, %v504_v39 }
 0x1a6   : > { %v1632_v52 = vpop.f32.mrb[0].mxu0 }
 0x1a7   : > { %v2111_v53 = vadd.f32 %v1632_v52, %v2107_v9  ;;  %v586_v10 = vpop.f32.mrb[1].mxu0 }
 0x1a8   : > { %v1633_v13 = vpop.f32.mrb[2].mxu0  ;;  %v2141_v3 = vadd.f32 %v2107_v9, %v586_v10  ;;  %v2242_v10 = vpop.permute.xlu1 %1161 }
 0x1a9   : > { %2785 = vst [vmem:[#allocation2_spill] sm:$0xff] %v2111_v53  ;;  %v2114_v14 = vadd.f32 %v1633_v13, %v2107_v9  ;;  %v589_v18 = vpop.f32.mrb[3].mxu0  ;;  %v782_v19 = vsel %vm779_vm1, %v2111_v53, -1e+30  ;;  %v830_v30 = vsel %vm779_vm1, -1e+30, %v2111_v53  ;;  %vm1200_vm14 = vcmp.eq.s32.totalorder %v2102_v63, %v2242_v10 }
 0x1aa   : > { %800 = vmax.xlane.f32.xlu0 %v782_v19  ;;  %v1640_v20 = vpop.f32.mrb[0].mxu1  ;;  %2787 = vst [vmem:[#allocation4_spill] sm:$0xff] %v2141_v3  ;;  %v2147_v25 = vadd.f32 %v2107_v9, %v589_v18  ;;  %v780_v33 = vsel %vm779_vm1, %v2141_v3, -1e+30  ;;  %v828_v29 = vsel %vm779_vm1, -1e+30, %v2141_v3 }
 0x1ab   : > { %2786 = vst [vmem:[#allocation3_spill] sm:$0xff] %v2114_v14  ;;  %v2120_v22 = vadd.f32 %v1640_v20, %v2107_v9  ;;  %v618_v24 = vpop.f32.mrb[1].mxu1  ;;  %v783_v21 = vsel %vm779_vm1, %v2114_v14, -1e+30  ;;  %v831_v31 = vsel %vm779_vm1, -1e+30, %v2114_v14 }
 0x1ac   : > { %802 = vmax.xlane.f32.xlu1 %v783_v21  ;;  %v1641_v26 = vpop.f32.mrb[2].mxu1  ;;  %2788 = vst [vmem:[#allocation5_spill] sm:$0xff] %v2147_v25  ;;  %v2153_v6 = vadd.f32 %v2107_v9, %v618_v24  ;;  %v781_v32 = vsel %vm779_vm1, %v2147_v25, -1e+30  ;;  %v829_v11 = vsel %vm779_vm1, -1e+30, %v2147_v25  ;;  %v2253_v19 = vpop.permute.xlu1 %1164 }
 0x1ad   : > { %v2126_v5 = vadd.f32 %v1641_v26, %v2107_v9  ;;  %v621_v1 = vpop.f32.mrb[3].mxu1  ;;  %v790_v27 = vsel %vm779_vm1, %v2120_v22, -1e+30  ;;  %v838_v0 = vsel %vm779_vm1, -1e+30, %v2120_v22 }
 0x1ae   : > { %816 = vmax.xlane.f32.xlu0 %v790_v27  ;;  %2789 = vst [vmem:[#allocation6_spill] sm:$0xff] %v2153_v6  ;;  %v2159_v34 = vadd.f32 %v2107_v9, %v621_v1  ;;  %v788_v2 = vsel %vm779_vm1, %v2153_v6, -1e+30  ;;  %v836_v15 = vsel %vm779_vm1, -1e+30, %v2153_v6  ;;  %v695_v1 = vshra.s32 %v2010_v60, 8  ;;  %v1150_v27 = vpop.permute.xlu0 %1149 }
 0x1af   : > { %v791_v28 = vsel %vm779_vm1, %v2126_v5, -1e+30  ;;  %v839_v4 = vsel %vm779_vm1, -1e+30, %v2126_v5  ;;  %vm1196_vm4 = vcmp.eq.s32.totalorder %v2102_v63, %v1150_v27 }
 0x1b0   : > { %818 = vmax.xlane.f32.xlu1 %v791_v28  ;;  %2790 = vst [vmem:[#allocation7_spill] sm:$0xff] %v2159_v34  ;;  %v789_v55 = vsel %vm779_vm1, %v2159_v34, -1e+30  ;;  %v837_v23 = vsel %vm779_vm1, -1e+30, %v2159_v34  ;;  %v1168_v26 = vpop.permute.xlu1 %1167 }
 0x1b2   : > { %848 = vmax.xlane.f32.xlu0 %v830_v30  ;;  %v696_v30 = vshra.s32 %v2005_v51, 8 }
 0x1b4   : > { %850 = vmax.xlane.f32.xlu1 %v831_v31  ;;  %v1171_v28 = vpop.permute.xlu1 %1170  ;;  %v711_v31 = vand.u32 255, %v695_v1 }
 0x1b5   : > { %vm1203_vm0 = vcmp.eq.s32.totalorder %v2102_v63, %v1171_v28 }
 0x1b6   : > { %864 = vmax.xlane.f32.xlu0 %v838_v0  ;;  %v2266_v0 = vpop.permute.xlu0 %1176 }
 0x1b8   : > { %866 = vmax.xlane.f32.xlu1 %v839_v4  ;;  %v712_v4 = vand.u32 255, %v696_v30 }
 0x1ba   : > { %796 = vmax.xlane.f32.xlu0 %v780_v33  ;;  %v2268_v33 = vpop.permute.xlu1 %1173 }
 0x1bc   : > { %798 = vmax.xlane.f32.xlu1 %v781_v32  ;;  %v727_v32 = vadd.s32 16, %v711_v31 }
 0x1be   : > { %812 = vmax.xlane.f32.xlu0 %v788_v2  ;;  %v728_v2 = vadd.s32 16, %v712_v4 }
 0x1c0   : > { %814 = vmax.xlane.f32.xlu1 %v789_v55  ;;  %v2270_v55 = vpop.permute.xlu0 %1182 }
 0x1c2   : > { %844 = vmax.xlane.f32.xlu0 %v828_v29  ;;  %v2272_v29 = vpop.permute.xlu1 %1179 }
 0x1c4   : > { %846 = vmax.xlane.f32.xlu1 %v829_v11  ;;  %v2274_v11 = vpop.permute.xlu0 %1188 }
 0x1c6   : > { %v1636_v46 = vpop.f32.mrb[4].mxu0  ;;  %860 = vmax.xlane.f32.xlu0 %v836_v15  ;;  %v2276_v60 = vpop.permute.xlu1 %1185 }
 0x1c7   : > { %v2180_v36 = vadd.f32 %v1636_v46, %v2107_v9  ;;  %v602_v12 = vpop.f32.mrb[5].mxu0 }
 0x1c8   : > { %v1637_v16 = vpop.f32.mrb[6].mxu0  ;;  %862 = vmax.xlane.f32.xlu1 %v837_v23  ;;  %v2217_v54 = vadd.f32 %v2107_v9, %v602_v12  ;;  %v2278_v15 = vpop.permute.xlu0 %1194 }
 0x1c9   : > { %2791 = vst [vmem:[#allocation8_spill] sm:$0xff] %v2180_v36  ;;  %v2186_v35 = vadd.f32 %v1637_v16, %v2107_v9  ;;  %v605_v56 = vpop.f32.mrb[7].mxu0  ;;  %v786_v41 = vsel %vm779_vm1, %v2180_v36, -1e+30  ;;  %v834_v61 = vsel %vm779_vm1, -1e+30, %v2180_v36 }
 0x1ca   : > { %v1644_v57 = vpop.f32.mrb[4].mxu1  ;;  %808 = vmax.xlane.f32.xlu0 %v786_v41  ;;  %2795 = vst [vmem:[#allocation12_spill] sm:$0xff] %v2217_v54  ;;  %v2225_v7 = vadd.f32 %v2107_v9, %v605_v56  ;;  %v784_v39 = vsel %vm779_vm1, %v2217_v54, -1e+30  ;;  %v2280_v51 = vpop.permute.xlu1 %1191 }
 0x1cb   : > { %2792 = vst [vmem:[#allocation9_spill] sm:$0xff] %v2186_v35  ;;  %v2192_v37 = vadd.f32 %v1644_v57, %v2107_v9  ;;  %v634_v40 = vpop.f32.mrb[5].mxu1  ;;  %v787_v58 = vsel %vm779_vm1, %v2186_v35, -1e+30  ;;  %v835_v43 = vsel %vm779_vm1, -1e+30, %v2186_v35 }
 0x1cc   : > { %v1645_v45 = vpop.f32.mrb[6].mxu1  ;;  %810 = vmax.xlane.f32.xlu1 %v787_v58  ;;  %2796 = vst [vmem:[#allocation13_spill] sm:$0xff] %v2225_v7  ;;  %v2231_v47 = vadd.f32 %v2107_v9, %v634_v40  ;;  %v785_v52 = vsel %vm779_vm1, %v2225_v7, -1e+30  ;;  %v833_v20 = vsel %vm779_vm1, -1e+30, %v2225_v7  ;;  %v1217_v46 = vpop.permute.xlu0 %1216 }
 0x1cd   : > { %2793 = vst [vmem:[#allocation10_spill] sm:$0xff] %v2192_v37  ;;  %v2200_v44 = vadd.f32 %v1645_v45, %v2107_v9  ;;  %v637_v17 = vpop.f32.mrb[7].mxu1  ;;  %v794_v59 = vsel %vm779_vm1, %v2192_v37, -1e+30  ;;  %v842_v50 = vsel %vm779_vm1, -1e+30, %v2192_v37  ;;  %vm1261_vm3 = vcmp.eq.s32.totalorder %v2102_v63, %v1217_v46 }
 0x1ce   : > { %824 = vmax.xlane.f32.xlu0 %v794_v59  ;;  %2797 = vst [vmem:[#allocation14_spill] sm:$0xff] %v2231_v47  ;;  %v2237_v48 = vadd.f32 %v2107_v9, %v637_v17  ;;  %v792_v13 = vsel %vm779_vm1, %v2231_v47, -1e+30  ;;  %v832_v9 = vsel %vm779_vm1, -1e+30, %v2217_v54  ;;  %v1214_v12 = vpop.permute.xlu1 %1213  ;;  %vm1277_vm6 = vmor %vm1197_vm2, %vm1261_vm3  ;;  %vm1202_vm3 = vcmp.eq.s32.totalorder %v2102_v63, %v1168_v26 }
 0x1cf   : > { %2794 = vst [vmem:[#allocation11_spill] sm:$0xff] %v2200_v44  ;;  %v795_v42 = vsel %vm779_vm1, %v2200_v44, -1e+30  ;;  %v843_v8 = vsel %vm779_vm1, -1e+30, %v2200_v44  ;;  %vm1260_vm5 = vcmp.eq.s32.totalorder %v2102_v63, %v1214_v12  ;;  %v1293_v57 = vsel %vm1277_vm6, %v2147_v25, 0.0 }
 0x1d0   : > { %826 = vmax.xlane.f32.xlu1 %v795_v42  ;;  %2798 = vst [vmem:[#allocation15_spill] sm:$0xff] %v2237_v48  ;;  %v793_v18 = vsel %vm779_vm1, %v2237_v48, -1e+30  ;;  %v840_v24 = vsel %vm779_vm1, -1e+30, %v2231_v47  ;;  %v1223_v23 = vpop.permute.xlu0 %1222  ;;  %vm1276_vm9 = vmor %vm1196_vm4, %vm1260_vm5 }
 0x1d1   : > { %v841_v21 = vsel %vm779_vm1, -1e+30, %v2237_v48  ;;  %vm1263_vm11 = vcmp.eq.s32.totalorder %v2102_v63, %v1223_v23  ;;  %v1292_v40 = vsel %vm1276_vm9, %v2141_v3, 0.0 }
 0x1d2   : > { %856 = vmax.xlane.f32.xlu0 %v834_v61  ;;  %v1220_v16 = vpop.permute.xlu1 %1219  ;;  %vm1279_vm13 = vmor %vm1199_vm10, %vm1263_vm11  ;;  %vm1204_vm11 = vcmp.eq.s32.totalorder %v2102_v63, %v2268_v33 }
 0x1d3   : > { %vm1262_vm8 = vcmp.eq.s32.totalorder %v2102_v63, %v1220_v16  ;;  %v1295_v17 = vsel %vm1279_vm13, %v2114_v14, 0.0  ;;  %vm1205_vm13 = vcmp.eq.s32.totalorder %v2102_v63, %v2266_v0 }
 0x1d4   : > { %858 = vmax.xlane.f32.xlu1 %v835_v43  ;;  %v1229_v56 = vpop.permute.xlu0 %1228  ;;  %vm1278_vm12 = vmor %vm1198_vm7, %vm1262_vm8  ;;  %vm1201_vm8 = vcmp.eq.s32.totalorder %v2102_v63, %v2253_v19 }
 0x1d5   : > { %v1294_v38 = vsel %vm1278_vm12, %v2111_v53, 0.0  ;;  %vm1265_vm9 = vcmp.eq.s32.totalorder %v2102_v63, %v1229_v56 }
 0x1d6   : > { %872 = vmax.xlane.f32.xlu0 %v842_v50  ;;  %v1226_v41 = vpop.permute.xlu1 %1225  ;;  %vm1281_vm10 = vmor %vm1201_vm8, %vm1265_vm9  ;;  %vm1209_vm9 = vcmp.eq.s32.totalorder %v2102_v63, %v2274_v11 }
 0x1d7   : > { %vm1264_vm15 = vcmp.eq.s32.totalorder %v2102_v63, %v1226_v41  ;;  %v1297_v61 = vsel %vm1281_vm10, %v2225_v7, 0.0 }
 0x1d8   : > { %874 = vmax.xlane.f32.xlu1 %v843_v8  ;;  %v1235_v58 = vpop.permute.xlu0 %1234  ;;  %vm1280_vm5 = vmor %vm1200_vm14, %vm1264_vm15 }
 0x1d9   : > { %vm1267_vm2 = vcmp.eq.s32.totalorder %v2102_v63, %v1235_v58  ;;  %v1296_v59 = vsel %vm1280_vm5, %v2217_v54, 0.0 }
 0x1da   : > { %804 = vmax.xlane.f32.xlu0 %v784_v39  ;;  %v1232_v45 = vpop.permute.xlu1 %1231  ;;  %vm1283_vm6 = vmor %vm1203_vm0, %vm1267_vm2  ;;  %vm1206_vm0 = vcmp.eq.s32.totalorder %v2102_v63, %v2272_v29 }
 0x1db   : > { %vm1266_vm4 = vcmp.eq.s32.totalorder %v2102_v63, %v1232_v45  ;;  %v1299_v42 = vsel %vm1283_vm6, %v2186_v35, 0.0 }
 0x1dc   : > { %806 = vmax.xlane.f32.xlu1 %v785_v52  ;;  %vm1282_vm7 = vmor %vm1202_vm3, %vm1266_vm4  ;;  %v2311_v43 = vpop.permute.xlu0 %1240  ;;  %vm1207_vm4 = vcmp.eq.s32.totalorder %v2102_v63, %v2270_v55 }
 0x1dd   : > { %v1298_v49 = vsel %vm1282_vm7, %v2180_v36, 0.0  ;;  %vm1269_vm14 = vcmp.eq.s32.totalorder %v2102_v63, %v2311_v43  ;;  %vm1208_vm7 = vcmp.eq.s32.totalorder %v2102_v63, %v2276_v60 }
 0x1de   : > { %820 = vmax.xlane.f32.xlu0 %v792_v13  ;;  %v2313_v50 = vpop.permute.xlu1 %1237  ;;  %vm1285_vm3 = vmor %vm1205_vm13, %vm1269_vm14  ;;  %vm1210_vm14 = vcmp.eq.s32.totalorder %v2102_v63, %v2280_v51 }
 0x1df   : > { %vm1268_vm12 = vcmp.eq.s32.totalorder %v2102_v63, %v2313_v50  ;;  %v1301_v29 = vsel %vm1285_vm3, %v2159_v34, 0.0 }
 0x1e0   : > { %822 = vmax.xlane.f32.xlu1 %v793_v18  ;;  %v2315_v62 = vpop.permute.xlu0 %1246  ;;  %vm1284_vm15 = vmor %vm1204_vm11, %vm1268_vm12 }
 0x1e1   : > { %vm1271_vm5 = vcmp.eq.s32.totalorder %v2102_v63, %v2315_v62  ;;  %v1300_v0 = vsel %vm1284_vm15, %v2153_v6, 0.0 }
 0x1e2   : > { %852 = vmax.xlane.f32.xlu0 %v832_v9  ;;  %v2317_v8 = vpop.permute.xlu1 %1243  ;;  %vm1287_vm8 = vmor %vm1207_vm4, %vm1271_vm5  ;;  %vm1372_vm4 = vcmp.eq.s32.totalorder %v2102_v63, 24 }
 0x1e3   : > { %vm1270_vm2 = vcmp.eq.s32.totalorder %v2102_v63, %v2317_v8  ;;  %v1303_v60 = vsel %vm1287_vm8, %v2126_v5, 0.0 }
 0x1e4   : > { %854 = vmax.xlane.f32.xlu1 %v833_v20  ;;  %v2319_v39 = vpop.permute.xlu0 %1252  ;;  %vm1286_vm6 = vmor %vm1206_vm0, %vm1270_vm2  ;;  %vm1211_vm2 = vcmp.eq.s32.totalorder %v2102_v63, %v2278_v15 }
 0x1e5   : > { %vm1273_vm10 = vcmp.eq.s32.totalorder %v2102_v63, %v2319_v39  ;;  %v1302_v55 = vsel %vm1286_vm6, %v2120_v22, 0.0 }
 0x1e6   : > { %868 = vmax.xlane.f32.xlu0 %v840_v24  ;;  %v2321_v52 = vpop.permute.xlu1 %1249  ;;  %vm1289_vm13 = vmor %vm1209_vm9, %vm1273_vm10 }
 0x1e7   : > { %v1305_v62 = vsel %vm1289_vm13, %v2237_v48, 0.0 }
 0x1e8   : > { %870 = vmax.xlane.f32.xlu1 %v841_v21 }
 0x1f9   : > { %1255 = vperm.xlu1 %1660, %v727_v32  }
 0x1fc   : > { %1258 = vperm.xlu0 %1659, %v728_v2  }
 0x21b   : > { %1310 = vadd.xlane.f32.xlu0 %v1293_v57 }
 0x21d   : > { %1308 = vadd.xlane.f32.xlu1 %v1292_v40 }
 0x21f   : > { %1312 = vadd.xlane.f32.xlu0 %v1294_v38 }
 0x221   : > { %1314 = vadd.xlane.f32.xlu1 %v1295_v17 }
 0x223   : > { %1316 = vadd.xlane.f32.xlu0 %v1296_v59 }
 0x225   : > { %1322 = vadd.xlane.f32.xlu1 %v1299_v42 }
 0x227   : > { %1320 = vadd.xlane.f32.xlu0 %v1298_v49 }
 0x229   : > { %1318 = vadd.xlane.f32.xlu1 %v1297_v61 }
 0x237   : > { %v2323_v10 = vpop.xlane.xlu0 %800 }
 0x239   : > { %v2325_v13 = vpop.xlane.xlu1 %802 }
 0x23b   : > { %v2327_v18 = vpop.xlane.xlu0 %816 }
 0x23d   : > { %v2329_v9 = vpop.xlane.xlu1 %818 }
 0x23f   : > { %v2331_v19 = vpop.xlane.xlu0 %848 }
 0x240   : > { %v878_v20 = vsel %vm779_vm1, %v2323_v10, %v2331_v19 }
 0x241   : > { %v894_v24 = vsub.f32 %v2111_v53, %v878_v20  ;;  %v2338_v21 = vpop.xlane.xlu1 %850 }
 0x242   : > { %v879_v26 = vsel %vm779_vm1, %v2325_v13, %v2338_v21 }
 0x243   : > { %v912_v1 = vmul.f32 1.442695, %v894_v24  ;;  %v895_v27 = vsub.f32 %v2114_v14, %v879_v26  ;;  %v2345_v28 = vpop.xlane.xlu0 %864 }
 0x244   : > { %v886_v30 = vsel %vm779_vm1, %v2327_v18, %v2345_v28 }
 0x245   : > { %1695 = vpow2.f32 %v912_v1  ;;  %v914_v31 = vmul.f32 1.442695, %v895_v27  ;;  %v902_v4 = vsub.f32 %v2120_v22, %v886_v30  ;;  %v2352_v32 = vpop.xlane.xlu1 %866 }
 0x246   : > { %v887_v2 = vsel %vm779_vm1, %v2329_v9, %v2352_v32 }
 0x247   : > { %1697 = vpow2.f32 %v914_v31  ;;  %v928_v46 = vmul.f32 1.442695, %v902_v4  ;;  %v903_v12 = vsub.f32 %v2126_v5, %v887_v2  ;;  %v2359_v23 = vpop.xlane.xlu0 %796 }
 0x249   : > { %1699 = vpow2.f32 %v928_v46  ;;  %v930_v16 = vmul.f32 1.442695, %v903_v12  ;;  %v2361_v56 = vpop.xlane.xlu1 %798 }
 0x24b   : > { %1701 = vpow2.f32 %v930_v16  ;;  %v2363_v41 = vpop.xlane.xlu0 %812 }
 0x24d   : > { %v2365_v57 = vpop.xlane.xlu1 %814 }
 0x24f   : > { %v1696_v40 = vpop.eup %1695  ;;  %v2367_v58 = vpop.xlane.xlu0 %844 }
 0x250   : > { %v876_v38 = vsel %vm779_vm1, %v2359_v23, %v2367_v58  ;;  %v942_v45 = vsel %vm779_vm1, %v1696_v40, 0.0 }
 0x251   : > { %v1698_v17 = vpop.eup %1697  ;;  %v892_v59 = vsub.f32 %v2141_v3, %v876_v38  ;;  %v2376_v42 = vpop.xlane.xlu1 %846  ;;  %960 = vadd.xlane.f32.xlu0 %v942_v45 }
 0x252   : > { %v877_v49 = vsel %vm779_vm1, %v2361_v56, %v2376_v42  ;;  %v943_v61 = vsel %vm779_vm1, %v1698_v17, 0.0 }
 0x253   : > { %v1700_v20 = vpop.eup %1699  ;;  %v908_v24 = vmul.f32 1.442695, %v892_v59  ;;  %v893_v26 = vsub.f32 %v2147_v25, %v877_v49  ;;  %962 = vadd.xlane.f32.xlu1 %v943_v61  ;;  %v2385_v1 = vpop.xlane.xlu0 %860  ;;  %v990_v49 = vsel %vm779_vm1, 0.0, %v1696_v40 }
 0x254   : > { %v884_v27 = vsel %vm779_vm1, %v2363_v41, %v2385_v1  ;;  %v950_v30 = vsel %vm779_vm1, %v1700_v20, 0.0 }
 0x255   : > { %v1702_v31 = vpop.eup %1701  ;;  %1703 = vpow2.f32 %v908_v24  ;;  %v910_v4 = vmul.f32 1.442695, %v893_v26  ;;  %v900_v2 = vsub.f32 %v2153_v6, %v884_v27  ;;  %v2394_v46 = vpop.xlane.xlu1 %862  ;;  %976 = vadd.xlane.f32.xlu0 %v950_v30  ;;  %v991_v26 = vsel %vm779_vm1, 0.0, %v1698_v17 }
 0x256   : > { %v885_v12 = vsel %vm779_vm1, %v2365_v57, %v2394_v46  ;;  %v951_v16 = vsel %vm779_vm1, %v1702_v31, 0.0  ;;  %v998_v30 = vsel %vm779_vm1, 0.0, %v1700_v20  ;;  %v999_v40 = vsel %vm779_vm1, 0.0, %v1702_v31 }
 0x257   : > { %1705 = vpow2.f32 %v910_v4  ;;  %v924_v38 = vmul.f32 1.442695, %v900_v2  ;;  %v901_v45 = vsub.f32 %v2159_v34, %v885_v12  ;;  %978 = vadd.xlane.f32.xlu1 %v951_v16  ;;  %v2403_v59 = vpop.xlane.xlu0 %808 }
 0x259   : > { %1707 = vpow2.f32 %v924_v38  ;;  %v926_v61 = vmul.f32 1.442695, %v901_v45  ;;  %v2407_v24 = vpop.xlane.xlu1 %810  ;;  %1008 = vadd.xlane.f32.xlu0 %v990_v49 }
 0x25b   : > { %1709 = vpow2.f32 %v926_v61  ;;  %1010 = vadd.xlane.f32.xlu1 %v991_v26  ;;  %v2411_v27 = vpop.xlane.xlu0 %824 }
 0x25c   : > { %2799 = vst [vmem:[#allocation16_spill] sm:$0xff] %v2411_v27 }
 0x25d   : > { %v2415_v4 = vpop.xlane.xlu1 %826  ;;  %1024 = vadd.xlane.f32.xlu0 %v998_v30 }
 0x25e   : > { %2800 = vst [vmem:[#allocation17_spill] sm:$0xff] %v2415_v4 }
 0x25f   : > { %v1704_v2 = vpop.eup %1703  ;;  %1026 = vadd.xlane.f32.xlu1 %v999_v40  ;;  %v2419_v12 = vpop.xlane.xlu0 %856 }
 0x260   : > { %v882_v17 = vsel %vm779_vm1, %v2403_v59, %v2419_v12  ;;  %v940_v16 = vsel %vm779_vm1, %v1704_v2, 0.0 }
 0x261   : > { %v1706_v38 = vpop.eup %1705  ;;  %v898_v20 = vsub.f32 %v2180_v36, %v882_v17  ;;  %v2428_v45 = vpop.xlane.xlu1 %858  ;;  %956 = vadd.xlane.f32.xlu0 %v940_v16 }
 0x262   : > { %v883_v31 = vsel %vm779_vm1, %v2407_v24, %v2428_v45  ;;  %v941_v49 = vsel %vm779_vm1, %v1706_v38, 0.0  ;;  %v989_v53 = vsel %vm779_vm1, 0.0, %v1706_v38 }
 0x263   : > { %v1708_v61 = vpop.eup %1707  ;;  %v920_v26 = vmul.f32 1.442695, %v898_v20  ;;  %v899_v30 = vsub.f32 %v2186_v35, %v883_v31  ;;  %958 = vadd.xlane.f32.xlu1 %v941_v49  ;;  %v2437_v40 = vpop.xlane.xlu0 %872 }
 0x264   : > { %2801 = vst [vmem:[#allocation18_spill] sm:$0xff] %v2437_v40  ;;  %v890_v17 = vsel %vm779_vm1, %v2411_v27, %v2437_v40  ;;  %v948_v16 = vsel %vm779_vm1, %v1708_v61, 0.0 }
 0x265   : > { %v1710_v36 = vpop.eup %1709  ;;  %1711 = vpow2.f32 %v920_v26  ;;  %v922_v25 = vmul.f32 1.442695, %v899_v30  ;;  %v906_v14 = vsub.f32 %v2192_v37, %v890_v17  ;;  %v2446_v3 = vpop.xlane.xlu1 %874  ;;  %972 = vadd.xlane.f32.xlu0 %v948_v16  ;;  %v988_v30 = vsel %vm779_vm1, 0.0, %v1704_v2 }
 0x266   : > { %2802 = vst [vmem:[#allocation19_spill] sm:$0xff] %v2446_v3  ;;  %v891_v20 = vsel %vm779_vm1, %v2415_v4, %v2446_v3  ;;  %v949_v31 = vsel %vm779_vm1, %v1710_v36, 0.0  ;;  %v997_v2 = vsel %vm779_vm1, 0.0, %v1710_v36 }
 0x267   : > { %1713 = vpow2.f32 %v922_v25  ;;  %v936_v49 = vmul.f32 1.442695, %v906_v14  ;;  %v907_v35 = vsub.f32 %v2200_v44, %v891_v20  ;;  %974 = vadd.xlane.f32.xlu1 %v949_v31  ;;  %v2455_v26 = vpop.xlane.xlu0 %804  ;;  %v996_v14 = vsel %vm779_vm1, 0.0, %v1708_v61 }
 0x269   : > { %1715 = vpow2.f32 %v936_v49  ;;  %v938_v17 = vmul.f32 1.442695, %v907_v35  ;;  %v2459_v16 = vpop.xlane.xlu1 %806  ;;  %1004 = vadd.xlane.f32.xlu0 %v988_v30 }
 0x26b   : > { %1717 = vpow2.f32 %v938_v17  ;;  %1006 = vadd.xlane.f32.xlu1 %v989_v53  ;;  %v2463_v25 = vpop.xlane.xlu0 %820 }
 0x26d   : > { %v2467_v20 = vpop.xlane.xlu1 %822  ;;  %1020 = vadd.xlane.f32.xlu0 %v996_v14 }
 0x26f   : > { %v1712_v35 = vpop.eup %1711  ;;  %1022 = vadd.xlane.f32.xlu1 %v997_v2  ;;  %v2471_v31 = vpop.xlane.xlu0 %852 }
 0x270   : > { %2803 = vst [vmem:[#allocation20_spill] sm:$0xff] %v2471_v31  ;;  %v880_v53 = vsel %vm779_vm1, %v2455_v26, %v2471_v31  ;;  %v946_v38 = vsel %vm779_vm1, %v1712_v35, 0.0 }
 0x271   : > { %v1714_v49 = vpop.eup %1713  ;;  %v896_v61 = vsub.f32 %v2217_v54, %v880_v53  ;;  %v2480_v30 = vpop.xlane.xlu1 %854  ;;  %968 = vadd.xlane.f32.xlu0 %v946_v38 }
 0x272   : > { %v881_v36 = vsel %vm779_vm1, %v2459_v16, %v2480_v30  ;;  %v947_v17 = vsel %vm779_vm1, %v1714_v49, 0.0 }
 0x273   : > { %v1716_v14 = vpop.eup %1715  ;;  %v916_v2 = vmul.f32 1.442695, %v896_v61  ;;  %v897_v40 = vsub.f32 %v2225_v7, %v881_v36  ;;  %970 = vadd.xlane.f32.xlu1 %v947_v17  ;;  %v2489_v3 = vpop.xlane.xlu0 %868 }
 0x274   : > { %v888_v53 = vsel %vm779_vm1, %v2463_v25, %v2489_v3  ;;  %v954_v38 = vsel %vm779_vm1, %v1716_v14, 0.0 }
 0x275   : > { %v1718_v54 = vpop.eup %1717  ;;  %1719 = vpow2.f32 %v916_v2  ;;  %v918_v27 = vmul.f32 1.442695, %v897_v40  ;;  %v904_v4 = vsub.f32 %v2231_v47, %v888_v53  ;;  %v2498_v31 = vpop.xlane.xlu1 %870  ;;  %984 = vadd.xlane.f32.xlu0 %v954_v38  ;;  %v994_v40 = vsel %vm779_vm1, 0.0, %v1712_v35 }
 0x276   : > { %v889_v61 = vsel %vm779_vm1, %v2467_v20, %v2498_v31  ;;  %v955_v36 = vsel %vm779_vm1, %v1718_v54, 0.0  ;;  %v995_v53 = vsel %vm779_vm1, 0.0, %v1714_v49  ;;  %v1002_v38 = vsel %vm779_vm1, 0.0, %v1716_v14 }
 0x277   : > { %1721 = vpow2.f32 %v918_v27  ;;  %v932_v17 = vmul.f32 1.442695, %v904_v4  ;;  %v905_v7 = vsub.f32 %v2237_v48, %v889_v61  ;;  %986 = vadd.xlane.f32.xlu1 %v955_v36  ;;  %v1003_v27 = vsel %vm779_vm1, 0.0, %v1718_v54 }
 0x279   : > { %1723 = vpow2.f32 %v932_v17  ;;  %v934_v2 = vmul.f32 1.442695, %v905_v7  ;;  %1016 = vadd.xlane.f32.xlu0 %v994_v40  ;;  %v1256_v43 = vpop.permute.xlu1 %1255 }
 0x27a   : > { %vm1274_vm11 = vcmp.eq.s32.totalorder %v2102_v63, %v1256_v43 }
 0x27b   : > { %1725 = vpow2.f32 %v934_v2  ;;  %1018 = vadd.xlane.f32.xlu1 %v995_v53  ;;  %v1259_v50 = vpop.permute.xlu0 %1258  ;;  %vm1290_vm0 = vmor %vm1210_vm14, %vm1274_vm11 }
 0x27c   : > { %vm1275_vm15 = vcmp.eq.s32.totalorder %v2102_v63, %v1259_v50  ;;  %v1306_v8 = vsel %vm1290_vm0, %v2192_v37, 0.0 }
 0x27d   : > { %1032 = vadd.xlane.f32.xlu0 %v1002_v38  ;;  %vm1291_vm3 = vmor %vm1211_vm2, %vm1275_vm15 }
 0x27e   : > { %v1307_v39 = vsel %vm1291_vm3, %v2200_v44, 0.0 }
 0x27f   : > { %v1720_v4 = vpop.eup %1719  ;;  %1034 = vadd.xlane.f32.xlu1 %v1003_v27 }
 0x280   : > { %v944_v35 = vsel %vm779_vm1, %v1720_v4, 0.0  ;;  %v992_v17 = vsel %vm779_vm1, 0.0, %v1720_v4 }
 0x281   : > { %v1722_v61 = vpop.eup %1721  ;;  %964 = vadd.xlane.f32.xlu0 %v944_v35 }
 0x282   : > { %v945_v7 = vsel %vm779_vm1, %v1722_v61, 0.0  ;;  %v993_v40 = vsel %vm779_vm1, 0.0, %v1722_v61 }
 0x283   : > { %v1724_v49 = vpop.eup %1723  ;;  %966 = vadd.xlane.f32.xlu1 %v945_v7 }
 0x284   : > { %v952_v36 = vsel %vm779_vm1, %v1724_v49, 0.0  ;;  %v1000_v2 = vsel %vm779_vm1, 0.0, %v1724_v49 }
 0x285   : > { %v1726_v14 = vpop.eup %1725  ;;  %980 = vadd.xlane.f32.xlu0 %v952_v36 }
 0x286   : > { %v953_v54 = vsel %vm779_vm1, %v1726_v14, 0.0  ;;  %v1001_v33 = vsel %vm779_vm1, 0.0, %v1726_v14  ;;  %vm1272_vm1 = vcmp.eq.s32.totalorder %v2102_v63, %v2321_v52 }
 0x287   : > { %982 = vadd.xlane.f32.xlu1 %v953_v54  ;;  %vm1288_vm12 = vmor %vm1208_vm7, %vm1272_vm1 }
 0x288   : > { %v1304_v11 = vsel %vm1288_vm12, %v2231_v47, 0.0 }
 0x289   : > { %1012 = vadd.xlane.f32.xlu0 %v992_v17 }
 0x28b   : > { %1014 = vadd.xlane.f32.xlu1 %v993_v40 }
 0x28d   : > { %1028 = vadd.xlane.f32.xlu0 %v1000_v2 }
 0x28f   : > { %1030 = vadd.xlane.f32.xlu1 %v1001_v33  ;;  %v1791_v33 = vld [vmem:[%s1989_s29 + $0x10] sm:$0xff] }
 0x291   : > { %1324 = vadd.xlane.f32.xlu0 %v1300_v0  ;;  %v731_v0 = vshra.s32 %v1791_v33, 16 }
 0x293   : > { %1326 = vadd.xlane.f32.xlu1 %v1301_v29  ;;  %v747_v50 = vand.u32 1, %v731_v0 }
 0x295   : > { %1328 = vadd.xlane.f32.xlu0 %v1302_v55 }
 0x297   : > { %1330 = vadd.xlane.f32.xlu1 %v1303_v60 }
 0x299   : > { %1332 = vadd.xlane.f32.xlu0 %v1304_v11 }
 0x29b   : > { %1334 = vadd.xlane.f32.xlu1 %v1305_v62 }
 0x29d   : > { %1336 = vadd.xlane.f32.xlu0 %v1306_v8 }
 0x29f   : > { %1338 = vadd.xlane.f32.xlu1 %v1307_v39 }
 0x2a8   : > { %v2569_v51 = vpop.xlane.xlu0 %1310 }
 0x2aa   : > { %v2571_v52 = vpop.xlane.xlu1 %1308 }
 0x2ac   : > { %v1313_v53 = vpop.xlane.xlu0 %1312 }
 0x2ae   : > { %v2573_v38 = vpop.xlane.xlu1 %1314 }
 0x2b0   : > { %v2575_v27 = vpop.xlane.xlu0 %1316 }
 0x2b2   : > { %v2577_v15 = vpop.xlane.xlu1 %1322 }
 0x2b4   : > { %v2579_v4 = vpop.xlane.xlu0 %1320 }
 0x2b6   : > { %v2581_v35 = vpop.xlane.xlu1 %1318 }
 0x2de   : > { %v961_v61 = vpop.xlane.xlu0 %960 }
 0x2df   : > { %1727 = vlog2.f32 %v961_v61 }
 0x2e0   : > { %v963_v7 = vpop.xlane.xlu1 %962 }
 0x2e2   : > { %v977_v49 = vpop.xlane.xlu0 %976 }
 0x2e4   : > { %v2583_v36 = vpop.xlane.xlu1 %978 }
 0x2e6   : > { %v1009_v14 = vpop.xlane.xlu0 %1008 }
 0x2e7   : > { %1729 = vlog2.f32 %v1009_v14 }
 0x2e8   : > { %v1011_v54 = vpop.xlane.xlu1 %1010  ;;  %1731 = vlog2.f32 %v963_v7 }
 0x2e9   : > { %v1728_v17 = vpop.eup %1727 }
 0x2ea   : > { %v1041_v40 = vmul.f32 0.6931472, %v1728_v17  ;;  %v1025_v2 = vpop.xlane.xlu0 %1024  ;;  %v763_v17 = vcvt.s32.f32 %v747_v50 }
 0x2ec   : > { %v2586_v29 = vpop.xlane.xlu1 %1026  ;;  %v1070_v43 = vadd.f32 %v1041_v40, %v2323_v10 }
 0x2ee   : > { %v957_v55 = vpop.xlane.xlu0 %956  ;;  %v1086_v62 = vadd.f32 %v1070_v43, %v2331_v19  ;;  %v1792_v19 = vld [vmem:[%s1989_s29] sm:$0xff] }
 0x2ef   : > { %1733 = vlog2.f32 %v957_v55  ;;  %v729_v43 = vshra.s32 %v1792_v19, 16 }
 0x2f0   : > { %v959_v60 = vpop.xlane.xlu1 %958  ;;  %1735 = vlog2.f32 %v1011_v54 }
 0x2f1   : > { %v1730_v11 = vpop.eup %1729 }
 0x2f2   : > { %v1105_v8 = vmul.f32 0.6931472, %v1730_v11  ;;  %v973_v39 = vpop.xlane.xlu0 %972  ;;  %v1732_v44 = vpop.eup %1731 }
 0x2f3   : > { %v1043_v0 = vmul.f32 0.6931472, %v1732_v44 }
 0x2f4   : > { %v1134_v61 = vadd.f32 %v1105_v8, %v1086_v62  ;;  %v975_v14 = vpop.xlane.xlu1 %974  ;;  %v1793_v62 = vld [vmem:[%s1989_s29 + $0x18] sm:$0xff]  ;;  %v745_v8 = vand.u32 1, %v729_v43 }
 0x2f5   : > { %v1071_v54 = vadd.f32 %v1043_v0, %v2325_v13 }
 0x2f6   : > { %v1342_v33 = vsub.f32 %v1134_v61, %v1313_v53  ;;  %v1005_v37 = vpop.xlane.xlu0 %1004 }
 0x2f7   : > { %1737 = vlog2.f32 %v1005_v37  ;;  %v732_v37 = vshra.s32 %v1793_v62, 16  ;;  %v1087_v44 = vadd.f32 %v1071_v54, %v2338_v21 }
 0x2f8   : > { %v1007_v10 = vpop.xlane.xlu1 %1006  ;;  %v1358_v7 = vmul.f32 %v1342_v33, %v763_v17 }
 0x2f9   : > { %v1734_v40 = vpop.eup %1733  ;;  %v748_v34 = vand.u32 1, %v732_v37  ;;  %v1794_v37 = vld [vmem:[%s1989_s29 + $0x30] sm:$0xff] }
 0x2fa   : > { %v1037_v55 = vmul.f32 0.6931472, %v1734_v40  ;;  %1385 = vperm.xlu1 %1660, %v1358_v7   ;;  %v1021_v47 = vpop.xlane.xlu0 %1020  ;;  %v1736_v48 = vpop.eup %1735 }
 0x2fb   : > { %v1107_v61 = vmul.f32 0.6931472, %v1736_v48 }
 0x2fc   : > { %v1023_v11 = vpop.xlane.xlu1 %1022  ;;  %v1068_v50 = vadd.f32 %v1037_v55, %v2359_v23  ;;  %v761_v23 = vcvt.s32.f32 %v745_v8  ;;  %v735_v8 = vshra.s32 %v1794_v37, 16 }
 0x2fd   : > { %v1135_v6 = vadd.f32 %v1107_v61, %v1087_v44 }
 0x2fe   : > { %v969_v53 = vpop.xlane.xlu0 %968  ;;  %v1084_v7 = vadd.f32 %v1068_v50, %v2367_v58  ;;  %v764_v58 = vcvt.s32.f32 %v748_v34 }
 0x2ff   : > { %1739 = vlog2.f32 %v969_v53  ;;  %v1343_v48 = vsub.f32 %v1135_v6, %v2573_v38  ;;  %v751_v38 = vand.u32 1, %v735_v8 }
 0x300   : > { %v971_v17 = vpop.xlane.xlu1 %970 }
 0x301   : > { %v1738_v33 = vpop.eup %1737 }
 0x302   : > { %v1101_v40 = vmul.f32 0.6931472, %v1738_v33  ;;  %v2596_v19 = vpop.xlane.xlu0 %984  ;;  %v1795_v33 = vld [vmem:[%s1989_s29 + $0x8] sm:$0xff] }
 0x303   : > { %v730_v44 = vshra.s32 %v1795_v33, 16 }
 0x304   : > { %v1132_v13 = vadd.f32 %v1101_v40, %v1084_v7  ;;  %v2598_v0 = vpop.xlane.xlu1 %986 }
 0x306   : > { %v1340_v55 = vsub.f32 %v1132_v13, %v2571_v52  ;;  %v1017_v43 = vpop.xlane.xlu0 %1016 }
 0x307   : > { %1741 = vlog2.f32 %v1017_v43 }
 0x308   : > { %1743 = vlog2.f32 %v977_v49  ;;  %v1019_v21 = vpop.xlane.xlu1 %1018  ;;  %v1356_v54 = vmul.f32 %v1340_v55, %v761_v23  ;;  %v1359_v49 = vmul.f32 %v1343_v48, %v764_v58  ;;  %v767_v23 = vcvt.s32.f32 %v751_v38 }
 0x309   : > { %v1740_v50 = vpop.eup %1739  ;;  %1745 = vlog2.f32 %v2583_v36  ;;  %v2615_v58 = vand.u32 1, %v730_v44 }
 0x30a   : > { %1747 = vlog2.f32 %v1025_v2  ;;  %v1049_v53 = vmul.f32 0.6931472, %v1740_v50  ;;  %1375 = vperm.xlu0 %1659, %v1356_v54   ;;  %v2603_v62 = vpop.xlane.xlu0 %1032  ;;  %v1798_v50 = vld [vmem:[%s1989_s29 + $0x38] sm:$0xff] }
 0x30b   : > { %1749 = vlog2.f32 %v959_v60 }
 0x30c   : > { %1751 = vlog2.f32 %v973_v39  ;;  %v2606_v52 = vpop.xlane.xlu1 %1034  ;;  %v1074_v6 = vadd.f32 %v1049_v53, %v2403_v59  ;;  %v1796_v59 = vld [vmem:[%s1989_s29 + $0x40] sm:$0xff]  ;;  %v736_v53 = vshra.s32 %v1798_v50, 16 }
 0x30d   : > { %1753 = vlog2.f32 %v975_v14  ;;  %v737_v7 = vshra.s32 %v1796_v59, 16 }
 0x30e   : > { %1755 = vlog2.f32 %v2586_v29  ;;  %1390 = vperm.xlu0 %1659, %v1359_v49   ;;  %v965_v34 = vpop.xlane.xlu0 %964  ;;  %v1090_v39 = vadd.f32 %v1074_v6, %v2419_v12 }
 0x30f   : > { %1757 = vlog2.f32 %v971_v17  ;;  %v2618_v37 = vand.u32 1, %v737_v7  ;;  %v1801_v7 = vld [vmem:[%s1989_s29 + $0x58] sm:$0xff] }
 0x310   : > { %1759 = vlog2.f32 %v1007_v10  ;;  %v967_v36 = vpop.xlane.xlu1 %966 }
 0x311   : > { %v1742_v2 = vpop.eup %1741  ;;  %1761 = vlog2.f32 %v1021_v47  ;;  %v1797_v47 = vld [vmem:[%s1989_s29 + $0x50] sm:$0xff] }
 0x312   : > { %v1744_v60 = vpop.eup %1743  ;;  %1763 = vlog2.f32 %v1023_v11  ;;  %v1113_v14 = vmul.f32 0.6931472, %v1742_v2  ;;  %v981_v61 = vpop.xlane.xlu0 %980  ;;  %v739_v13 = vshra.s32 %v1797_v47, 16  ;;  %v2626_v2 = vld [vmem:[%s1989_s29 + $0x20] sm:$0xff]  ;;  %v2632_v47 = vld [vmem:[%s1989_s29 + $0x28] sm:$0xff] }
 0x313   : > { %v1746_v29 = vpop.eup %1745  ;;  %1765 = vlog2.f32 %v967_v36  ;;  %v1057_v55 = vmul.f32 0.6931472, %v1744_v60 }
 0x314   : > { %v1748_v17 = vpop.eup %1747  ;;  %v1138_v40 = vadd.f32 %v1113_v14, %v1090_v39  ;;  %1767 = vlog2.f32 %v1019_v21  ;;  %v983_v10 = vpop.xlane.xlu1 %982  ;;  %v1799_v21 = vld [vmem:[%s1989_s29 + $0x48] sm:$0xff]  ;;  %v1059_v6 = vmul.f32 0.6931472, %v1746_v29  ;;  %v2621_v38 = vand.u32 1, %v739_v13 }
 0x315   : > { %v1750_v11 = vpop.eup %1749  ;;  %1769 = vlog2.f32 %v965_v34  ;;  %v738_v8 = vshra.s32 %v1799_v21, 16  ;;  %v1078_v44 = vadd.f32 %v1057_v55, %v2327_v18  ;;  %v734_v13 = vshra.s32 %v2632_v47, 16 }
 0x316   : > { %v1752_v12 = vpop.eup %1751  ;;  %v1346_v43 = vsub.f32 %v1138_v40, %v2579_v4  ;;  %v1013_v48 = vpop.xlane.xlu0 %1012  ;;  %1771 = vlog2.f32 %v983_v10  ;;  %v1039_v39 = vmul.f32 0.6931472, %v1750_v11  ;;  %v740_v40 = vshra.s32 %v1801_v7, 16 }
 0x317   : > { %v1754_v54 = vpop.eup %1753  ;;  %v1053_v14 = vmul.f32 0.6931472, %v1752_v12  ;;  %1773 = vlog2.f32 %v981_v61  ;;  %v2638_v11 = vand.u32 1, %v738_v8  ;;  %v1079_v12 = vadd.f32 %v1059_v6, %v2329_v9 }
 0x318   : > { %v1756_v49 = vpop.eup %1755  ;;  %v1015_v34 = vpop.xlane.xlu1 %1014  ;;  %v2623_v4 = vmul.f32 %v1346_v43, %v767_v23  ;;  %v1055_v29 = vmul.f32 0.6931472, %v1754_v54  ;;  %v2635_v23 = vand.u32 1, %v736_v53  ;;  %v771_v54 = vcvt.s32.f32 %v2621_v38 }
 0x319   : > { %v1758_v36 = vpop.eup %1757  ;;  %1775 = vlog2.f32 %v1015_v34  ;;  %v1121_v21 = vmul.f32 0.6931472, %v1748_v17  ;;  %v1069_v34 = vadd.f32 %v1039_v39, %v2361_v56  ;;  %v1076_v7 = vadd.f32 %v1053_v14, %v2363_v41 }
 0x31a   : > { %v1760_v33 = vpop.eup %1759  ;;  %v1029_v59 = vpop.xlane.xlu0 %1028  ;;  %v1051_v18 = vmul.f32 0.6931472, %v1758_v36  ;;  %1777 = vlog2.f32 %v1013_v48  ;;  %v1077_v8 = vadd.f32 %v1055_v29, %v2365_v57  ;;  %v1094_v9 = vadd.f32 %v1078_v44, %v2345_v28 }
 0x31b   : > { %v1762_v10 = vpop.eup %1761  ;;  %1779 = vlog2.f32 %v2598_v0  ;;  %v756_v6 = vand.u32 1, %v740_v40  ;;  %v1123_v36 = vmul.f32 0.6931472, %v1756_v49  ;;  %v1103_v43 = vmul.f32 0.6931472, %v1760_v33 }
 0x31c   : > { %v1764_v61 = vpop.eup %1763  ;;  %v1031_v55 = vpop.xlane.xlu1 %1030  ;;  %v1117_v38 = vmul.f32 0.6931472, %v1762_v10  ;;  %v1075_v56 = vadd.f32 %v1051_v18, %v2407_v24  ;;  %v1085_v39 = vadd.f32 %v1069_v34, %v2376_v42  ;;  %v1092_v57 = vadd.f32 %v1076_v7, %v2385_v1 }
 0x31d   : > { %v1766_v50 = vpop.eup %1765  ;;  %1781 = vlog2.f32 %v1031_v55  ;;  %v1119_v17 = vmul.f32 0.6931472, %v1764_v61  ;;  %v1142_v14 = vadd.f32 %v1121_v21, %v1094_v9  ;;  %v1095_v28 = vadd.f32 %v1079_v12, %v2352_v32 }
 0x31e   : > { %v1768_v53 = vpop.eup %1767  ;;  %v1325_v60 = vpop.xlane.xlu0 %1324  ;;  %1783 = vlog2.f32 %v2596_v19  ;;  %v1047_v41 = vmul.f32 0.6931472, %v1766_v50  ;;  %v1093_v33 = vadd.f32 %v1077_v8, %v2394_v46  ;;  %v772_v19 = vcvt.s32.f32 %v756_v6 }
 0x31f   : > { %v1770_v48 = vpop.eup %1769  ;;  %1785 = vlog2.f32 %v1029_v59  ;;  %v1115_v29 = vmul.f32 0.6931472, %v1768_v53  ;;  %v1133_v61 = vadd.f32 %v1103_v43, %v1085_v39  ;;  %v1140_v24 = vadd.f32 %v1117_v38, %v1092_v57 }
 0x320   : > { %v1327_v0 = vpop.xlane.xlu1 %1326  ;;  %v1772_v44 = vpop.eup %1771  ;;  %v1045_v49 = vmul.f32 0.6931472, %v1770_v48  ;;  %v1143_v59 = vadd.f32 %v1123_v36, %v1095_v28  ;;  %v1091_v42 = vadd.f32 %v1075_v56, %v2428_v45  ;;  %1787 = vlog2.f32 %v2606_v52 }
 0x321   : > { %v1774_v10 = vpop.eup %1773  ;;  %v1073_v1 = vadd.f32 %v1047_v41, %v2459_v16  ;;  %v1141_v32 = vadd.f32 %v1119_v17, %v1093_v33  ;;  %v1063_v50 = vmul.f32 0.6931472, %v1772_v44  ;;  %v1348_v21 = vsub.f32 %v1140_v24, %v1325_v60  ;;  %v1804_v44 = vld [vmem:[%s1989_s29 + $0x60] sm:$0xff] }
 0x322   : > { %v1329_v40 = vpop.xlane.xlu0 %1328  ;;  %v1139_v53 = vadd.f32 %v1115_v29, %v1091_v42  ;;  %1789 = vlog2.f32 %v2603_v62  ;;  %v1072_v43 = vadd.f32 %v1045_v49, %v2455_v26  ;;  %v770_v8 = vcvt.s32.f32 %v2638_v11 }
 0x323   : > { %v1350_v18 = vsub.f32 %v1142_v14, %v1329_v40  ;;  %v1776_v55 = vpop.eup %1775  ;;  %v1061_v45 = vmul.f32 0.6931472, %v1774_v10  ;;  %v1349_v52 = vsub.f32 %v1141_v32, %v1327_v0  ;;  %v750_v60 = vand.u32 1, %v734_v13 }
 0x324   : > { %v1331_v12 = vpop.xlane.xlu1 %1330  ;;  %v1778_v7 = vpop.eup %1777  ;;  %v1111_v6 = vmul.f32 0.6931472, %v1776_v55  ;;  %v762_v36 = vcvt.s32.f32 %v2615_v58  ;;  %v768_v62 = vcvt.s32.f32 %v2635_v23  ;;  %v1081_v11 = vadd.f32 %v1063_v50, %v2467_v20  ;;  %v1803_v58 = vld [vmem:[%s1989_s29 + $0x68] sm:$0xff] }
 0x325   : > { %v1366_v34 = vmul.f32 %v1350_v18, %v771_v54  ;;  %v1351_v46 = vsub.f32 %v1143_v59, %v1331_v12  ;;  %v1780_v9 = vpop.eup %1779  ;;  %v1341_v54 = vsub.f32 %v1133_v61, %v2569_v51  ;;  %v1109_v38 = vmul.f32 0.6931472, %v1778_v7  ;;  %v2805_v51 = vld [vmem:[#allocation20_spill] sm:$0xff]  ;;  %v1805_v59 = vld [vmem:[%s1989_s29 + $0x78] sm:$0xff] }
 0x326   : > { %v1089_v17 = vadd.f32 %v1073_v1, %v2480_v30  ;;  %v2804_v56 = vcvt.s32.f32 %v2618_v37  ;;  %v1067_v47 = vmul.f32 0.6931472, %v1780_v9  ;;  %v1347_v13 = vsub.f32 %v1139_v53, %v2577_v15  ;;  %v2808_v53 = vld [vmem:[#allocation16_spill] sm:$0xff] }
 0x327   : > { %v1367_v48 = vmul.f32 %v1351_v46, %v772_v19  ;;  %1425 = vperm.xlu1 %1660, %v1366_v34   ;;  %v1782_v16 = vpop.eup %1781  ;;  %v1088_v39 = vadd.f32 %v1072_v43, %v2805_v51  ;;  %v742_v57 = vshra.s32 %v1803_v58, 16  ;;  %v1080_v23 = vadd.f32 %v1061_v45, %v2463_v25  ;;  %v2807_v25 = vld [vmem:[#allocation17_spill] sm:$0xff]  ;;  %v1806_v34 = vld [vmem:[%s1989_s29 + $0x70] sm:$0xff] }
 0x328   : > { %v1784_v26 = vpop.eup %1783  ;;  %v1364_v41 = vmul.f32 %v1348_v21, %v2804_v56  ;;  %v1137_v14 = vadd.f32 %v1111_v6, %v1089_v17  ;;  %v1127_v20 = vmul.f32 0.6931472, %v1782_v16  ;;  %v1365_v28 = vmul.f32 %v1349_v52, %v770_v8  ;;  %v1335_v18 = vpop.xlane.xlu1 %1334 }
 0x329   : > { %1430 = vperm.xlu0 %1659, %v1367_v48   ;;  %v1786_v0 = vpop.eup %1785  ;;  %v2806_v30 = vshra.s32 %v2626_v2, 16  ;;  %v741_v29 = vshra.s32 %v1804_v44, 16  ;;  %v1357_v49 = vmul.f32 %v1341_v54, %v762_v36  ;;  %v1065_v33 = vmul.f32 0.6931472, %v1784_v26  ;;  %v2809_v48 = vld [vmem:[#allocation19_spill] sm:$0xff] }
 0x32a   : > { %v1136_v40 = vadd.f32 %v1109_v38, %v1088_v39  ;;  %v1125_v15 = vmul.f32 0.6931472, %v1786_v0  ;;  %v1097_v19 = vadd.f32 %v1081_v11, %v2498_v31  ;;  %v1788_v10 = vpop.eup %1787  ;;  %v1083_v61 = vadd.f32 %v1067_v47, %v2807_v25  ;;  %v1333_v31 = vpop.xlane.xlu0 %1332  ;;  %v2810_v11 = vld [vmem:[#allocation18_spill] sm:$0xff] }
 0x32b   : > { %1415 = vperm.xlu1 %1660, %v1364_v41   ;;  %v749_v37 = vand.u32 1, %v2806_v30  ;;  %v758_v24 = vand.u32 1, %v742_v57  ;;  %v744_v55 = vshra.s32 %v1805_v59, 16  ;;  %v766_v42 = vcvt.s32.f32 %v750_v60  ;;  %v2812_v30 = vld [vmem:[#allocation4_spill] sm:$0xff]  ;;  %v2814_v25 = vld [vmem:[#allocation6_spill] sm:$0xff] }
 0x32c   : > { %v1345_v2 = vsub.f32 %v1137_v14, %v2581_v35  ;;  %v1096_v1 = vadd.f32 %v1080_v23, %v2489_v3  ;;  %v1145_v32 = vadd.f32 %v1127_v20, %v1097_v19  ;;  %v1363_v12 = vmul.f32 %v1347_v13, %v768_v62  ;;  %v1790_v50 = vpop.eup %1789  ;;  %v1339_v62 = vpop.xlane.xlu1 %1338  ;;  %v2811_v14 = vld [vmem:[#allocation2_spill] sm:$0xff] }
 0x32d   : > { %1420 = vperm.xlu0 %1659, %v1365_v28   ;;  %v757_v21 = vand.u32 1, %v741_v29  ;;  %v743_v46 = vshra.s32 %v1806_v34, 16  ;;  %v765_v7 = vcvt.s32.f32 %v749_v37  ;;  %v1082_v43 = vadd.f32 %v1065_v33, %v2808_v53  ;;  %v2813_v29 = vld [vmem:[#allocation3_spill] sm:$0xff] }
 0x32e   : > { %v1131_v8 = vmul.f32 0.6931472, %v1788_v10  ;;  %v1344_v9 = vsub.f32 %v1136_v40, %v2575_v27  ;;  %v1144_v45 = vadd.f32 %v1125_v15, %v1096_v1  ;;  %v774_v6 = vcvt.s32.f32 %v758_v24  ;;  %v1337_v56 = vpop.xlane.xlu0 %1336 }
 0x32f   : > { %1380 = vperm.xlu1 %1660, %v1357_v49   ;;  %v760_v35 = vand.u32 1, %v744_v55  ;;  %v1129_v52 = vmul.f32 0.6931472, %v1790_v50  ;;  %v1353_v3 = vsub.f32 %v1145_v32, %v1335_v18  ;;  %v1099_v16 = vadd.f32 %v1083_v61, %v2809_v48  ;;  %v2815_v18 = vld [vmem:[#allocation7_spill] sm:$0xff]  ;;  %v2816_v55 = vld [vmem:[#allocation5_spill] sm:$0xff] }
 0x330   : > { %v1361_v60 = vmul.f32 %v1345_v2, %v766_v42  ;;  %v773_v54 = vcvt.s32.f32 %v757_v21  ;;  %v759_v36 = vand.u32 1, %v743_v46  ;;  %v1352_v26 = vsub.f32 %v1144_v45, %v1333_v31  ;;  %v2817_v2 = vld [vmem:[#allocation9_spill] sm:$0xff] }
 0x331   : > { %1410 = vperm.xlu0 %1659, %v1363_v12   ;;  %v1098_v38 = vadd.f32 %v1082_v43, %v2810_v11  ;;  %v1147_v17 = vadd.f32 %v1131_v8, %v1099_v16  ;;  %v1360_v27 = vmul.f32 %v1344_v9, %v765_v7  ;;  %v1369_v41 = vmul.f32 %v1353_v3, %v774_v6  ;;  %v2818_v12 = vld [vmem:[#allocation8_spill] sm:$0xff]  ;;  %v2819_v31 = vld [vmem:[#allocation13_spill] sm:$0xff]  ;;  %v2821_v8 = vld [vmem:[#allocation15_spill] sm:$0xff] }
 0x332   : > { %v776_v47 = vcvt.s32.f32 %v760_v35  ;;  %v1368_v51 = vmul.f32 %v1352_v26, %v773_v54  ;;  %v775_v39 = vcvt.s32.f32 %v759_v36  ;;  %v2820_v7 = vld [vmem:[#allocation12_spill] sm:$0xff]  ;;  %v2822_v6 = vld [vmem:[#allocation14_spill] sm:$0xff]  ;;  %v2823_v3 = vld [vmem:[#allocation11_spill] sm:$0xff] }
 0x333   : > { %1405 = vperm.xlu1 %1660, %v2623_v4   ;;  %v1146_v0 = vadd.f32 %v1129_v52, %v1098_v38  ;;  %v1355_v13 = vsub.f32 %v1147_v17, %v1339_v62 }
 0x335   : > { %1400 = vperm.xlu0 %1659, %v1361_v60   ;;  %v1354_v4 = vsub.f32 %v1146_v0, %v1337_v56  ;;  %v1371_v58 = vmul.f32 %v1355_v13, %v776_v47  ;;  %v2824_v60 = vld [vmem:[#allocation10_spill] sm:$0xff] }
 0x337   : > { %1395 = vperm.xlu1 %1660, %v1360_v27   ;;  %v1370_v57 = vmul.f32 %v1354_v4, %v775_v39 }
 0x339   : > { %1440 = vperm.xlu0 %1659, %v1369_v41  }
 0x33b   : > { %1435 = vperm.xlu1 %1660, %v1368_v51  }
 0x33d   : > { %1450 = vperm.xlu0 %1659, %v1371_v58  }
 0x33f   : > { %1445 = vperm.xlu1 %1660, %v1370_v57  }
 0x379   : > { %v1386_v23 = vpop.permute.xlu1 %1385 }
 0x37a   : > { %v1455_v20 = vsel %vm1372_vm4, %v1386_v23, %v2811_v14 }
 0x37b   : > { %1471 = vst [vmem:[%s2692_s8 + $0x10] sm:$0xff] %v1455_v20 }
 0x389   : > { %v1376_v28 = vpop.permute.xlu0 %1375 }
 0x38a   : > { %v1453_v37 = vsel %vm1372_vm4, %v1376_v28, %v2812_v30 }
 0x38b   : > { %1469 = vst [vmem:[%s2692_s8] sm:$0xff] %v1453_v37 }
 0x38d   : > { %v1391_v44 = vpop.permute.xlu0 %1390 }
 0x38e   : > { %v1456_v49 = vsel %vm1372_vm4, %v1391_v44, %v2813_v29 }
 0x38f   : > { %1472 = vst [vmem:[%s2692_s8 + $0x18] sm:$0xff] %v1456_v49 }
 0x3a6   : > { %v1426_v33 = vpop.permute.xlu1 %1425 }
 0x3a7   : > { %v1463_v40 = vsel %vm1372_vm4, %v1426_v33, %v2120_v22 }
 0x3a8   : > { %1479 = vst [vmem:[%s2692_s8 + $0x50] sm:$0xff] %v1463_v40  ;;  %v1431_v15 = vpop.permute.xlu0 %1430 }
 0x3a9   : > { %v1464_v19 = vsel %vm1372_vm4, %v1431_v15, %v2126_v5 }
 0x3aa   : > { %1480 = vst [vmem:[%s2692_s8 + $0x58] sm:$0xff] %v1464_v19  ;;  %v1416_v10 = vpop.permute.xlu1 %1415 }
 0x3ab   : > { %v1461_v61 = vsel %vm1372_vm4, %v1416_v10, %v2814_v25 }
 0x3ac   : > { %1477 = vst [vmem:[%s2692_s8 + $0x40] sm:$0xff] %v1461_v61  ;;  %v1421_v24 = vpop.permute.xlu0 %1420 }
 0x3ad   : > { %v1462_v22 = vsel %vm1372_vm4, %v1421_v24, %v2815_v18 }
 0x3ae   : > { %1478 = vst [vmem:[%s2692_s8 + $0x48] sm:$0xff] %v1462_v22  ;;  %v1381_v59 = vpop.permute.xlu1 %1380 }
 0x3af   : > { %v1454_v5 = vsel %vm1372_vm4, %v1381_v59, %v2816_v55 }
 0x3b0   : > { %1470 = vst [vmem:[%s2692_s8 + $0x8] sm:$0xff] %v1454_v5  ;;  %v1411_v42 = vpop.permute.xlu0 %1410 }
 0x3b1   : > { %v1460_v1 = vsel %vm1372_vm4, %v1411_v42, %v2817_v2 }
 0x3b2   : > { %1476 = vst [vmem:[%s2692_s8 + $0x38] sm:$0xff] %v1460_v1  ;;  %v1406_v32 = vpop.permute.xlu1 %1405 }
 0x3b3   : > { %v1459_v50 = vsel %vm1372_vm4, %v1406_v32, %v2818_v12 }
 0x3b4   : > { %1475 = vst [vmem:[%s2692_s8 + $0x30] sm:$0xff] %v1459_v50  ;;  %v1401_v21 = vpop.permute.xlu0 %1400 }
 0x3b5   : > { %v1458_v34 = vsel %vm1372_vm4, %v1401_v21, %v2819_v31 }
 0x3b6   : > { %1474 = vst [vmem:[%s2692_s8 + $0x28] sm:$0xff] %v1458_v34  ;;  %v1396_v46 = vpop.permute.xlu1 %1395 }
 0x3b7   : > { %v1457_v53 = vsel %vm1372_vm4, %v1396_v46, %v2820_v7 }
 0x3b8   : > { %1473 = vst [vmem:[%s2692_s8 + $0x20] sm:$0xff] %v1457_v53  ;;  %v1441_v43 = vpop.permute.xlu0 %1440 }
 0x3b9   : > { %v1466_v9 = vsel %vm1372_vm4, %v1441_v43, %v2821_v8 }
 0x3ba   : > { %1482 = vst [vmem:[%s2692_s8 + $0x68] sm:$0xff] %v1466_v9  ;;  %v1436_v45 = vpop.permute.xlu1 %1435 }
 0x3bb   : > { %v1465_v35 = vsel %vm1372_vm4, %v1436_v45, %v2822_v6 }
 0x3bc   : > { %1481 = vst [vmem:[%s2692_s8 + $0x60] sm:$0xff] %v1465_v35  ;;  %v1451_v52 = vpop.permute.xlu0 %1450 }
 0x3bd   : > { %v1468_v48 = vsel %vm1372_vm4, %v1451_v52, %v2823_v3 }
 0x3be   : > { %1484 = vst [vmem:[%s2692_s8 + $0x78] sm:$0xff] %v1468_v48  ;;  %v1446_v16 = vpop.permute.xlu1 %1445 }
 0x3bf   : > { %v1467_v54 = vsel %vm1372_vm4, %v1446_v16, %v2824_v60 }
 0x3c0   : > { %1483 = vst [vmem:[%s2692_s8 + $0x70] sm:$0xff] %v1467_v54 }
 0x3c1 PF: > { %s14_s15 = sadd.s32 1, %s1813_s15  }
 0x3c2   : > { %p11_p4 = scmp.ge.s32.totalorder %s14_s15, 4  }
 0x3c4   :  { %13 = sbr.rel (!%p11_p4) target bundleno = 1 (0x1), region = 69 }

</bundles_post_ra>
